<compile_context>
chip_gen: v6e
topology: v6e:2x2x1
jax: 0.10.0
libtpu: 0.0.40
codegen_flags: <defaults>
</compile_context>

<pallas_src>
import functools

import jax
import jax.numpy as jnp
import numpy as np
from jax.experimental import pallas as pl
from jax.experimental.pallas import tpu as pltpu


def _round_up(a: int, m: int) -> int:
    return -(-a // m) * m


def _mvnormal_kernel(x_ref, w_ref, b_ref, sel_ref, mean_ref, cov_ref):
    # x_ref:    (TB, D)
    # w_ref:    (D, 2D)   fused weight [Wm.T | Ws.T]  (in, out layout)
    # b_ref:    (1, 2D)   fused bias   [bm   | bs  ]
    # sel_ref:  (D, D*D)  row j has a single 1 at flat column j*D + j
    # mean_ref: (TB, D)
    # cov_ref:  (TB, D*D) lane-dense flattened diag_embed(exp(sc))
    D = mean_ref.shape[-1]
    hp = jax.lax.Precision.HIGHEST  # keep exp values exact through the MXU

    # Fused linear: one MXU matmul gives [mean | sc] in a single (TB, 2D) slab.
    y = jnp.dot(x_ref[...], w_ref[...],
                preferred_element_type=jnp.float32, precision=hp)
    y = y + b_ref[...]

    mean_ref[...] = y[:, :D].astype(mean_ref.dtype)

    # exp of the sc half only (EUP), then diag_embed via an MXU "scatter"
    # matmul -> flat, lane-dense cov block.
    e = jnp.exp(y[:, D:])                                           # (TB, D)
    cov = jnp.dot(e, sel_ref[...],
                  preferred_element_type=jnp.float32, precision=hp)  # (TB, D*D)
    cov_ref[...] = cov.astype(cov_ref.dtype)


@functools.lru_cache(maxsize=None)
def _diag_selector(D: int):
    # Built once per latent_dim (hoisted out of the per-call path).
    # TODO(synk): for large latent_dim (>~128) this (D, D*D) selector stops
    # fitting comfortably in VMEM; switch the cov path there to an eye-mask
    # multiply over a 3-D (TB, D, D) output block.
    sel = np.zeros((D, D * D), np.float32)
    sel[np.arange(D), np.arange(D) * (D + 1)] = 1.0
    return jnp.asarray(sel)


def fuse_params(w_mean, b_mean, w_sc, b_sc):
    """Fuse the two torch-style Linear layers once (call at init, not per step)."""
    w_fused = jnp.concatenate([w_mean.T, w_sc.T], axis=1).astype(jnp.float32)
    b_fused = jnp.concatenate([b_mean, b_sc]).reshape(1, -1).astype(jnp.float32)
    return w_fused, b_fused


def _choose_batch_tile(B: int, D: int, sublane: int = 8, out_bytes: int = 4) -> int:
    B_sub = _round_up(max(B, 1), sublane)
    cov_row_bytes = D * D * out_bytes
    # ~8 MiB of cov per buffer (16 MiB double-buffered): per-step overhead
    # (~0.35 us) drops below ~5% even at v7x's 3.2 TB/s HBM, while staying
    # inside the scoped-VMEM limit we request below.
    per_buffer_budget = 8 * 1024 * 1024
    tb_cap = max(sublane, (per_buffer_budget // cov_row_bytes) // sublane * sublane)
    tb_cap = min(tb_cap, 4096)
    if B_sub <= tb_cap:
        return B_sub                      # whole batch in one step, no pad waste
    # Padding-aware: pick the step count first, then the smallest TB covering B
    # in that many steps (pad waste < n_steps * sublane rows).  Keep >= 8 steps
    # when the batch allows tiles >= 256 rows so the "parallel" axis still
    # splits across v7x's two TensorCores and double-buffering has depth.
    n_steps = pl.cdiv(B_sub, tb_cap)
    if n_steps < 8 and B_sub >= 8 * 256:
        n_steps = 8
    return _round_up(pl.cdiv(B_sub, n_steps), sublane)


def _build_specs(TB: int, D: int, buffered_residents: bool):
    res_kw = {"pipeline_mode": pl.Buffered(1)} if buffered_residents else {}
    in_specs = [
        pl.BlockSpec((TB, D), lambda i: (i, 0)),                   # x (batch-tiled)
        pl.BlockSpec((D, 2 * D), lambda i: (0, 0), **res_kw),      # fused weight
        pl.BlockSpec((1, 2 * D), lambda i: (0, 0), **res_kw),      # fused bias
        pl.BlockSpec((D, D * D), lambda i: (0, 0), **res_kw),      # diag selector
    ]
    out_specs = (
        pl.BlockSpec((TB, D), lambda i: (i, 0)),                   # mean
        pl.BlockSpec((TB, D * D), lambda i: (i, 0)),               # cov, flat
    )
    return in_specs, out_specs


def mvnormal_forward(x, w_fused, b_fused):
    """x: (B, D); w_fused: (D, 2D); b_fused: (1, 2D) from fuse_params()."""
    B, D = x.shape
    D2 = D * D
    out_dtype = x.dtype
    dtype_bytes = jnp.dtype(out_dtype).itemsize

    sel = _diag_selector(D)

    TB = _choose_batch_tile(B, D, out_bytes=dtype_bytes)
    B_pad = _round_up(B, TB)
    x_p = jnp.pad(x, ((0, B_pad - B), (0, 0))) if B_pad != B else x
    n_steps = B_pad // TB

    # Scoped-VMEM budget: double-buffered x / mean / cov tiles plus (worst case
    # double-buffered) resident operands, with margin.  v5e's default scoped
    # limit is only 16 MiB, so this must be set explicitly once TB grows.
    resident_bytes = (D * 2 * D + 2 * D + D * D2) * 4
    vmem_need = (2 * (TB * D * 4 + TB * D * dtype_bytes + TB * D2 * dtype_bytes)
                 + 2 * resident_bytes)
    vmem_limit = int(min(max(32 << 20, int(1.5 * vmem_need)), 56 << 20))

    cost = pl.CostEstimate(
        flops=2 * B_pad * D * (2 * D) + 2 * B_pad * D * D2,
        transcendentals=B_pad * D,
        bytes_accessed=(B_pad * D * 4 + resident_bytes
                        + B_pad * D * dtype_bytes + B_pad * D2 * dtype_bytes),
    )

    def call(buffered_residents):
        in_specs, out_specs = _build_specs(TB, D, buffered_residents)
        return pl.pallas_call(
            _mvnormal_kernel,
            out_shape=(
                jax.ShapeDtypeStruct((B_pad, D), out_dtype),
                jax.ShapeDtypeStruct((B_pad, D2), out_dtype),
            ),
            grid=(n_steps,),
            in_specs=in_specs,
            out_specs=out_specs,
            compiler_params=pltpu.CompilerParams(
                dimension_semantics=("parallel",),
                vmem_limit_bytes=vmem_limit,
            ),
            cost_estimate=cost,
        )(x_p, w_fused, b_fused, sel)

    try:
        mean_p, cov_flat_p = call(True)
    except Exception:
        # pipeline_mode=pl.Buffered(1) not supported on this JAX build; fall
        # back to default double-buffering of the (small) resident operands.
        mean_p, cov_flat_p = call(False)

    mean = mean_p[:B]
    cov = cov_flat_p[:B].reshape(B, D, D)
    return mean, cov


def _reference(x, w_mean, b_mean, w_sc, b_sc):
    hp = jax.lax.Precision.HIGHEST
    mean = jnp.dot(x, w_mean.T, precision=hp) + b_mean
    sc = jnp.dot(x, w_sc.T, precision=hp) + b_sc
    e = jnp.exp(sc)
    D = x.shape[1]
    cov = jnp.zeros((x.shape[0], D, D), x.dtype)
    cov = cov.at[:, jnp.arange(D), jnp.arange(D)].set(e)
    return mean, cov


if __name__ == "__main__":
    B, D = 4, 32  # batch, latent_dim

    key = jax.random.PRNGKey(0)
    kx, kwm, kbm, kws, kbs = jax.random.split(key, 5)

    # Deterministic parameter init (torch.nn.Linear shapes: W (out,in), b (out,))
    bound = 1.0 / (D ** 0.5)
    x = jax.random.normal(kx, (B, D), dtype=jnp.float32)
    w_mean = jax.random.uniform(kwm, (D, D), jnp.float32, -bound, bound)
    b_mean = jax.random.uniform(kbm, (D,), jnp.float32, -bound, bound)
    w_sc = jax.random.uniform(kws, (D, D), jnp.float32, -bound, bound)
    b_sc = jax.random.uniform(kbs, (D,), jnp.float32, -bound, bound)

    # Fuse the two Linear layers once (hoisted out of the per-call path).
    w_fused, b_fused = fuse_params(w_mean, b_mean, w_sc, b_sc)

    mean, cov = mvnormal_forward(x, w_fused, b_fused)
    jax.block_until_ready((mean, cov))

    # Sanity check against a pure-JAX reference.
    ref_mean, ref_cov = _reference(x, w_mean, b_mean, w_sc, b_sc)
    assert mean.shape == (B, D) and cov.shape == (B, D, D)
    assert jnp.allclose(mean, ref_mean, atol=1e-5, rtol=1e-5)
    assert jnp.allclose(cov, ref_cov, atol=1e-5, rtol=1e-5)

    print("KERNEL_OK")
</pallas_src>

<mosaic_0001>
module attributes {stable_mosaic.version = 11 : i64} {
  func.func @_mvnormal_kernel(%arg0: i32, %arg1: memref<8x32xf32, #tpu.memory_space<vmem>>, %arg2: memref<32x64xf32, #tpu.memory_space<vmem>>, %arg3: memref<1x64xf32, #tpu.memory_space<vmem>>, %arg4: memref<32x1024xf32, #tpu.memory_space<vmem>>, %arg5: memref<8x32xf32, #tpu.memory_space<vmem>>, %arg6: memref<8x1024xf32, #tpu.memory_space<vmem>>) attributes {dimension_semantics = [#tpu.dimension_semantics<parallel>], iteration_bounds = array<i64: 1>, scalar_prefetch = 0 : i64, scratch_operands = 0 : i64, tpu.core_type = #tpu.core_type<tc>, window_params = [{transform_indices = @transform_0, window_bounds = array<i64: 8, 32>}, {pipeline_mode = #tpu.pipeline_mode<synchronous>, transform_indices = @transform_1, window_bounds = array<i64: 32, 64>}, {pipeline_mode = #tpu.pipeline_mode<synchronous>, transform_indices = @transform_2, window_bounds = array<i64: 1, 64>}, {pipeline_mode = #tpu.pipeline_mode<synchronous>, transform_indices = @transform_3, window_bounds = array<i64: 32, 1024>}, {transform_indices = @transform_4, window_bounds = array<i64: 8, 32>}, {transform_indices = @transform_5, window_bounds = array<i64: 8, 1024>}]} {
    %c0 = arith.constant 0 : index
    %c0_0 = arith.constant 0 : index
    %0 = vector.load %arg1[%c0, %c0_0] : memref<8x32xf32, #tpu.memory_space<vmem>>, vector<8x32xf32>
    %c0_1 = arith.constant 0 : index
    %c0_2 = arith.constant 0 : index
    %1 = vector.load %arg2[%c0_1, %c0_2] : memref<32x64xf32, #tpu.memory_space<vmem>>, vector<32x64xf32>
    %cst = arith.constant dense<0.000000e+00> : vector<8x64xf32>
    %2 = tpu.matmul %0, %1, %cst {dimension_numbers = #tpu.dot_dimension_numbers<[1], [0], [0], [1], [0, 0, 1, 1], [], []>, precision = #tpu.contract_precision<fp32>} : vector<8x32xf32>, vector<32x64xf32>, vector<8x64xf32> -> vector<8x64xf32>
    %c0_3 = arith.constant 0 : index
    %c0_4 = arith.constant 0 : index
    %3 = vector.load %arg3[%c0_3, %c0_4] : memref<1x64xf32, #tpu.memory_space<vmem>>, vector<1x64xf32>
    %4 = vector.broadcast %3 : vector<1x64xf32> to vector<8x64xf32>
    %5 = arith.addf %2, %4 : vector<8x64xf32>
    %6 = vector.extract_strided_slice %5 {offsets = [0, 0], sizes = [8, 32], strides = [1, 1]} : vector<8x64xf32> to vector<8x32xf32>
    %c0_5 = arith.constant 0 : index
    %c0_6 = arith.constant 0 : index
    %7 = vector.load %arg5[%c0_5, %c0_6] : memref<8x32xf32, #tpu.memory_space<vmem>>, vector<8x32xf32>
    tpu.vector_store %arg5[%c0_5, %c0_6], %6 {strides = array<i32>} : memref<8x32xf32, #tpu.memory_space<vmem>>, vector<8x32xf32>,
    %8 = vector.extract_strided_slice %5 {offsets = [0, 32], sizes = [8, 32], strides = [1, 1]} : vector<8x64xf32> to vector<8x32xf32>
    %9 = math.exp %8 : vector<8x32xf32>
    %c0_7 = arith.constant 0 : index
    %c0_8 = arith.constant 0 : index
    %10 = vector.load %arg4[%c0_7, %c0_8] : memref<32x1024xf32, #tpu.memory_space<vmem>>, vector<32x1024xf32>
    %cst_9 = arith.constant dense<0.000000e+00> : vector<8x1024xf32>
    %11 = tpu.matmul %9, %10, %cst_9 {dimension_numbers = #tpu.dot_dimension_numbers<[1], [0], [0], [1], [0, 0, 1, 1], [], []>, precision = #tpu.contract_precision<fp32>} : vector<8x32xf32>, vector<32x1024xf32>, vector<8x1024xf32> -> vector<8x1024xf32>
    %c0_10 = arith.constant 0 : index
    %c0_11 = arith.constant 0 : index
    %12 = vector.load %arg6[%c0_10, %c0_11] : memref<8x1024xf32, #tpu.memory_space<vmem>>, vector<8x1024xf32>
    tpu.vector_store %arg6[%c0_10, %c0_11], %11 {strides = array<i32>} : memref<8x1024xf32, #tpu.memory_space<vmem>>, vector<8x1024xf32>,
    return
  }
  func.func @transform_0(%arg0: i32) -> (i32, i32) {
    %c0_i32 = arith.constant 0 : i32
    %c0_i32_0 = arith.constant 0 : i32
    return %arg0, %c0_i32 : i32, i32
  }
  func.func @transform_1(%arg0: i32) -> (i32, i32) {
    %c0_i32 = arith.constant 0 : i32
    %c0_i32_0 = arith.constant 0 : i32
    %c0_i32_1 = arith.constant 0 : i32
    return %c0_i32, %c0_i32_0 : i32, i32
  }
  func.func @transform_2(%arg0: i32) -> (i32, i32) {
    %c0_i32 = arith.constant 0 : i32
    %c0_i32_0 = arith.constant 0 : i32
    %c0_i32_1 = arith.constant 0 : i32
    return %c0_i32, %c0_i32_0 : i32, i32
  }
  func.func @transform_3(%arg0: i32) -> (i32, i32) {
    %c0_i32 = arith.constant 0 : i32
    %c0_i32_0 = arith.constant 0 : i32
    %c0_i32_1 = arith.constant 0 : i32
    return %c0_i32, %c0_i32_0 : i32, i32
  }
  func.func @transform_4(%arg0: i32) -> (i32, i32) {
    %c0_i32 = arith.constant 0 : i32
    %c0_i32_0 = arith.constant 0 : i32
    return %arg0, %c0_i32 : i32, i32
  }
  func.func @transform_5(%arg0: i32) -> (i32, i32) {
    %c0_i32 = arith.constant 0 : i32
    %c0_i32_0 = arith.constant 0 : i32
    return %arg0, %c0_i32 : i32, i32
  }
}

module attributes {stable_mosaic.version = 11 : i64} {
  func.func @_mvnormal_kernel(%arg0: i32, %arg1: memref<8x32xf32, #tpu.memory_space<vmem>>, %arg2: memref<32x64xf32, #tpu.memory_space<vmem>>, %arg3: memref<1x64xf32, #tpu.memory_space<vmem>>, %arg4: memref<32x1024xf32, #tpu.memory_space<vmem>>, %arg5: memref<8x32xf32, #tpu.memory_space<vmem>>, %arg6: memref<8x1024xf32, #tpu.memory_space<vmem>>) attributes {dimension_semantics = [#tpu.dimension_semantics<parallel>], iteration_bounds = array<i64: 1>, scalar_prefetch = 0 : i64, scratch_operands = 0 : i64, tpu.core_type = #tpu.core_type<tc>, window_params = [{transform_indices = @transform_0, window_bounds = array<i64: 8, 32>}, {pipeline_mode = #tpu.pipeline_mode<synchronous>, transform_indices = @transform_1, window_bounds = array<i64: 32, 64>}, {pipeline_mode = #tpu.pipeline_mode<synchronous>, transform_indices = @transform_2, window_bounds = array<i64: 1, 64>}, {pipeline_mode = #tpu.pipeline_mode<synchronous>, transform_indices = @transform_3, window_bounds = array<i64: 32, 1024>}, {transform_indices = @transform_4, window_bounds = array<i64: 8, 32>}, {transform_indices = @transform_5, window_bounds = array<i64: 8, 1024>}]} {
    %c0 = arith.constant 0 : index
    %c0_0 = arith.constant 0 : index
    %0 = vector.load %arg1[%c0, %c0_0] : memref<8x32xf32, #tpu.memory_space<vmem>>, vector<8x32xf32>
    %c0_1 = arith.constant 0 : index
    %c0_2 = arith.constant 0 : index
    %1 = vector.load %arg2[%c0_1, %c0_2] : memref<32x64xf32, #tpu.memory_space<vmem>>, vector<32x64xf32>
    %cst = arith.constant dense<0.000000e+00> : vector<8x64xf32>
    %2 = tpu.matmul %0, %1, %cst {dimension_numbers = #tpu.dot_dimension_numbers<[1], [0], [0], [1], [0, 0, 1, 1], [], []>, precision = #tpu.contract_precision<fp32>} : vector<8x32xf32>, vector<32x64xf32>, vector<8x64xf32> -> vector<8x64xf32>
    %c0_3 = arith.constant 0 : index
    %c0_4 = arith.constant 0 : index
    %3 = vector.load %arg3[%c0_3, %c0_4] : memref<1x64xf32, #tpu.memory_space<vmem>>, vector<1x64xf32>
    %4 = vector.broadcast %3 : vector<1x64xf32> to vector<8x64xf32>
    %5 = arith.addf %2, %4 : vector<8x64xf32>
    %6 = vector.extract_strided_slice %5 {offsets = [0, 0], sizes = [8, 32], strides = [1, 1]} : vector<8x64xf32> to vector<8x32xf32>
    %c0_5 = arith.constant 0 : index
    %c0_6 = arith.constant 0 : index
    %7 = vector.load %arg5[%c0_5, %c0_6] : memref<8x32xf32, #tpu.memory_space<vmem>>, vector<8x32xf32>
    tpu.vector_store %arg5[%c0_5, %c0_6], %6 {strides = array<i32>} : memref<8x32xf32, #tpu.memory_space<vmem>>, vector<8x32xf32>,
    %8 = vector.extract_strided_slice %5 {offsets = [0, 32], sizes = [8, 32], strides = [1, 1]} : vector<8x64xf32> to vector<8x32xf32>
    %9 = math.exp %8 : vector<8x32xf32>
    %c0_7 = arith.constant 0 : index
    %c0_8 = arith.constant 0 : index
    %10 = vector.load %arg4[%c0_7, %c0_8] : memref<32x1024xf32, #tpu.memory_space<vmem>>, vector<32x1024xf32>
    %cst_9 = arith.constant dense<0.000000e+00> : vector<8x1024xf32>
    %11 = tpu.matmul %9, %10, %cst_9 {dimension_numbers = #tpu.dot_dimension_numbers<[1], [0], [0], [1], [0, 0, 1, 1], [], []>, precision = #tpu.contract_precision<fp32>} : vector<8x32xf32>, vector<32x1024xf32>, vector<8x1024xf32> -> vector<8x1024xf32>
    %c0_10 = arith.constant 0 : index
    %c0_11 = arith.constant 0 : index
    %12 = vector.load %arg6[%c0_10, %c0_11] : memref<8x1024xf32, #tpu.memory_space<vmem>>, vector<8x1024xf32>
    tpu.vector_store %arg6[%c0_10, %c0_11], %11 {strides = array<i32>} : memref<8x1024xf32, #tpu.memory_space<vmem>>, vector<8x1024xf32>,
    return
  }
  func.func @transform_0(%arg0: i32) -> (i32, i32) {
    %c0_i32 = arith.constant 0 : i32
    %c0_i32_0 = arith.constant 0 : i32
    return %arg0, %c0_i32 : i32, i32
  }
  func.func @transform_1(%arg0: i32) -> (i32, i32) {
    %c0_i32 = arith.constant 0 : i32
    %c0_i32_0 = arith.constant 0 : i32
    %c0_i32_1 = arith.constant 0 : i32
    return %c0_i32, %c0_i32_0 : i32, i32
  }
  func.func @transform_2(%arg0: i32) -> (i32, i32) {
    %c0_i32 = arith.constant 0 : i32
    %c0_i32_0 = arith.constant 0 : i32
    %c0_i32_1 = arith.constant 0 : i32
    return %c0_i32, %c0_i32_0 : i32, i32
  }
  func.func @transform_3(%arg0: i32) -> (i32, i32) {
    %c0_i32 = arith.constant 0 : i32
    %c0_i32_0 = arith.constant 0 : i32
    %c0_i32_1 = arith.constant 0 : i32
    return %c0_i32, %c0_i32_0 : i32, i32
  }
  func.func @transform_4(%arg0: i32) -> (i32, i32) {
    %c0_i32 = arith.constant 0 : i32
    %c0_i32_0 = arith.constant 0 : i32
    return %arg0, %c0_i32 : i32, i32
  }
  func.func @transform_5(%arg0: i32) -> (i32, i32) {
    %c0_i32 = arith.constant 0 : i32
    %c0_i32_0 = arith.constant 0 : i32
    return %arg0, %c0_i32 : i32, i32
  }
}

</mosaic_0001>

<bundles_post_ra>
// kernel: tpu_custom_call.1
= control target key start
LH: loop header
LB: loop body
LE: loop exit
PB: predicated region body
PF: predicated region fallthrough
CT: control target
= control target key end

     0   :  { %11 = vsyncpa [#allocation3], 0  ;;  %s3699_s0 = inlined_call_operand.hbm [shape: f32[8,32], index: 0, kind: input, shape index: {}]   ;;  %s3700_s1 = inlined_call_operand.hbm [shape: f32[32,64], index: 1, kind: input, shape index: {}]   ;;  %s3701_s2 = inlined_call_operand.vmem [shape: f32[1,64], index: 2, kind: input, shape index: {}]   ;;  %s3702_s3 = inlined_call_operand.hbm [shape: f32[32,1024], index: 3, kind: input, shape index: {}]   ;;  %s3703_s4 = inlined_call_operand.hbm [shape: f32[8,32], index: 4, kind: output, shape index: {0}]   ;;  %s3704_s5 = inlined_call_operand.hbm [shape: f32[8,1024], index: 5, kind: output, shape index: {1}]  }
   0x1   :  { %12 = vsyncpa [#allocation6], 0 }
   0x2   :  { %13 = vsyncpa [#allocation4], 0 }
   0x3   :  { %14 = vsyncpa [#allocation10], 0  ;;  %s3030_s18 = smov [#allocation5]  }
   0x4   :  { %s30_s19 = sshll.u32 %s3030_s18, 4  ;;  %s31_s19 = int_to_ptr.vmem [resolvable:$true] %s30_s19 }
   0x5   :  { %s2930_s20 = scalar_lea.vmem %s31_s19, 512  ;;  %p2935_p1 = scmp.lt.s32.totalorder %s31_s19, %s31_s19 }
   0x6   :  { %p2931_p0 = scmp.ne.s32.totalorder %s31_s19, %s2930_s20  ;;  %p2936_p2 = scmp.lt.s32.totalorder %s2930_s20, %s2930_s20 }
   0x8   :  { %p2937_p3 = por %p2936_p2, %p2935_p1 }
   0xa   :  { %p2938_p4 = pnand %p2937_p3, %p2931_p0 }
   0xc   :  { %2941 = shalt.err (!%p2938_p4)
}
   0xd   :  { %s3031_s21 = smov 128   ;;  %s3032_s22 = smov 8  }
   0xe   :  { %36 = dma.hbm_to_vmem [thread:$0]  %s3700_s1, 512, %s31_s19, [#allocation6], %s3031_s21, %s3031_s21, %s3032_s22  }
   0xf   :  { %s3033_s25 = smov [#allocation2]   ;;  %s3034_s27 = smov [#allocation7]  }
  0x10   :  { %s21_s26 = sshll.u32 %s3033_s25, 4  ;;  %s44_s28 = sshll.u32 %s3034_s27, 4  ;;  %s22_s26 = int_to_ptr.vmem [resolvable:$true] %s21_s26  ;;  %s45_s28 = int_to_ptr.vmem [resolvable:$true] %s44_s28 }
  0x11   :  { %s2950_s29 = scalar_lea.vmem %s22_s26, 128  ;;  %p2955_p6 = scmp.lt.s32.totalorder %s22_s26, %s22_s26 }
  0x12   :  { %p2951_p5 = scmp.ne.s32.totalorder %s22_s26, %s2950_s29  ;;  %p2956_p7 = scmp.lt.s32.totalorder %s2950_s29, %s2950_s29 }
  0x14   :  { %p2957_p8 = por %p2956_p7, %p2955_p6 }
  0x16   :  { %p2958_p9 = pnand %p2957_p8, %p2951_p5 }
  0x18   :  { %2961 = shalt.err (!%p2958_p9)
}
  0x19   :  { %24 = dma.hbm_to_vmem [thread:$0]  %s3699_s0, 128, %s22_s26, [#allocation3]  }
  0x1a   :  { %s2970_s7 = scalar_lea.vmem %s45_s28, 4096  ;;  %p2975_p11 = scmp.lt.s32.totalorder %s45_s28, %s45_s28 }
  0x1b   :  { %p2971_p10 = scmp.ne.s32.totalorder %s45_s28, %s2970_s7  ;;  %p2976_p12 = scmp.lt.s32.totalorder %s2970_s7, %s2970_s7 }
  0x1d   :  { %p2977_p13 = por %p2976_p12, %p2975_p11 }
  0x1f   :  { %p2978_p0 = pnand %p2977_p13, %p2971_p10 }
  0x21   :  { %2981 = shalt.err (!%p2978_p0)
}
  0x22   :  { %s3035_s1 = smov 1024   ;;  %s3036_s8 = smov 64  }
  0x23   :  { %50 = dma.hbm_to_vmem [thread:$0]  %s3702_s3, 4096, %s45_s28, [#allocation6], %s3035_s1, %s3035_s1, %s3036_s8  }
  0x24   :  { %3022 = dma.done.wait [#allocation3], 128  }
  0x25   :  { %3023 = vsyncadd [#allocation3], 4294967168 }
  0x26   :  { %3024 = dma.done.wait [#allocation6], 4608  }
  0x27   :  { %3025 = vsyncadd [#allocation6], 4294962688  ;;  %v3037_v0 = vmov 0.0   ;;  %vm3038_vm0 = vmmov 0   ;;  %vm72_vm1 = vcmask 261120   ;;  %v64_v1 = vld [vmem:[#allocation5 + $0x18] sm:$0xff] }
  0x28   :  { %2842 = vmatprep.subr.mxu0 %v3037_v0  ;;  %2853 = vmatprep.subr.mxu1 %v3037_v0  ;;  %v63_v2 = vld [vmem:[#allocation5 + $0x10] sm:$0xff]  ;;  %v62_v3 = vld [vmem:[#allocation5 + $0x8] sm:$0xff]  ;;  %v3087_v4 = vand.u32 4294901760, %v64_v1  ;;  %v61_v7 = vld [vmem:[#allocation5] sm:$0xff]  ;;  %s3040_s11 = smov [#allocation8]  }
  0x29   :  { %2850 = vmatprep.mubr.msk.f32.mxu0 %vm3038_vm0, %v3037_v0  ;;  %2861 = vmatprep.mubr.msk.f32.mxu1 %vm3038_vm0, %v3037_v0  ;;  %v3089_v5 = vand.u32 4294901760, %v63_v2  ;;  %v3091_v6 = vand.u32 4294901760, %v62_v3  ;;  %v60_v8 = vld [vmem:[#allocation2] sm:$0xff]  ;;  %v3093_v9 = vand.u32 4294901760, %v61_v7  ;;  %v589_v32 = vld [vmem:[#allocation7 + $0xc8] sm:$0xff]  ;;  %v588_v33 = vld [vmem:[#allocation7 + $0xc0] sm:$0xff] }
  0x2a   :  { %v74_v10 = vsel %vm72_vm1, %v60_v8, 0  ;;  %2843 = vmatpush3.msra.mxu0 %v3087_v4  ;;  %v181_v11 = vsub.f32 %v64_v1, %v3087_v4  ;;  %v581_v34 = vld [vmem:[#allocation7 + $0x88] sm:$0xff]  ;;  %v3150_v35 = vand.u32 4294901760, %v589_v32  ;;  %v3152_v36 = vand.u32 4294901760, %v588_v33  ;;  %v580_v38 = vld [vmem:[#allocation7 + $0x80] sm:$0xff]  ;;  %s2787_s12 = sshll.u32 %s3040_s11, 4  ;;  %s2788_s12 = int_to_ptr.vmem [resolvable:$true] %s2787_s12 }
  0x2b   :  { %v3098_v12 = vand.u32 4294901760, %v74_v10  ;;  %v188_v13 = vsub.f32 %v63_v2, %v3089_v5  ;;  %v195_v14 = vsub.f32 %v62_v3, %v3091_v6  ;;  %2844 = vmatprep.subr.mxu0 %v3037_v0  ;;  %v202_v15 = vsub.f32 %v61_v7, %v3093_v9  ;;  %v573_v39 = vld [vmem:[#allocation7 + $0x48] sm:$0xff]  ;;  %v2811_v2 = vld [vmem:[%s3701_s2] ss:$0 sm:$0xff]  ;;  %s3039_s2 = smov 96   ;;  %s2982_s13 = scalar_lea.vmem %s2788_s12, 128 }
  0x2c   :  { %2845 = vmatpush3.msra.mxu0 %v3089_v5  ;;  %v182_v16 = vand.u32 4294901760, %v181_v11  ;;  %v3154_v37 = vand.u32 4294901760, %v581_v34  ;;  %v3156_v40 = vand.u32 4294901760, %v580_v38  ;;  %v3158_v41 = vand.u32 4294901760, %v573_v39  ;;  %p2983_p1 = scmp.ne.s32.totalorder %s2788_s12, %s2982_s13  ;;  %p2987_p2 = scmp.lt.s32.totalorder %s2788_s12, %s2788_s12 }
  0x2d   :  { %v146_v17 = vsub.f32 %v74_v10, %v3098_v12  ;;  %v189_v18 = vand.u32 4294901760, %v188_v13  ;;  %v196_v19 = vand.u32 4294901760, %v195_v14  ;;  %2846 = vmatprep.subr.mxu0 %v3037_v0  ;;  %v203_v20 = vand.u32 4294901760, %v202_v15  ;;  %p2988_p3 = scmp.lt.s32.totalorder %s2982_s13, %s2982_s13 }
  0x2e   :  { %2847 = vmatpush3.msra.mxu0 %v3091_v6  ;;  %v183_v21 = vsub.f32 %v181_v11, %v182_v16  ;;  %v3161_v42 = vsub.f32 %v589_v32, %v3150_v35  ;;  %v3164_v43 = vsub.f32 %v588_v33, %v3152_v36  ;;  %v3167_v44 = vsub.f32 %v581_v34, %v3154_v37 }
  0x2f   :  { %v147_v22 = vand.u32 4294901760, %v146_v17  ;;  %v190_v23 = vsub.f32 %v188_v13, %v189_v18  ;;  %v197_v24 = vsub.f32 %v195_v14, %v196_v19  ;;  %2848 = vmatprep.subr.mxu0 %v3037_v0  ;;  %v204_v28 = vsub.f32 %v202_v15, %v203_v20  ;;  %p2989_p4 = por %p2988_p3, %p2987_p2 }
  0x30   :  { %2849 = vmatpush3.msra.mxu0 %v3093_v9  ;;  %v184_v25 = vand.u32 4294901760, %v183_v21  ;;  %v3171_v45 = vsub.f32 %v580_v38, %v3156_v40  ;;  %v3174_v46 = vsub.f32 %v573_v39, %v3158_v41  ;;  %v711_v47 = vand.u32 4294901760, %v3161_v42 }
  0x31   :  { %v148_v26 = vsub.f32 %v146_v17, %v147_v22  ;;  %v191_v27 = vand.u32 4294901760, %v190_v23  ;;  %2864 = vmatprep.subr.mxu0 %v3037_v0  ;;  %v198_v30 = vand.u32 4294901760, %v197_v24  ;;  %v205_v31 = vand.u32 4294901760, %v204_v28  ;;  %p2990_p5 = pnand %p2989_p4, %p2983_p1 }
  0x32   :  { %2854 = vmatpush3.msra.mxu1 %v184_v25  ;;  %v717_v48 = vand.u32 4294901760, %v3164_v43  ;;  %v723_v49 = vand.u32 4294901760, %v3167_v44  ;;  %v729_v50 = vand.u32 4294901760, %v3171_v45  ;;  %v735_v51 = vand.u32 4294901760, %v3174_v46 }
  0x33   :  { %v149_v29 = vand.u32 4294901760, %v148_v26  ;;  %2855 = vmatprep.subr.mxu1 %v3037_v0  ;;  %v712_v52 = vsub.f32 %v3161_v42, %v711_v47 }
  0x34   :  { %2856 = vmatpush3.msra.mxu1 %v191_v27  ;;  %v718_v53 = vsub.f32 %v3164_v43, %v717_v48  ;;  %v724_v54 = vsub.f32 %v3167_v44, %v723_v49  ;;  %v730_v55 = vsub.f32 %v3171_v45, %v729_v50  ;;  %v736_v56 = vsub.f32 %v3174_v46, %v735_v51 }
  0x35   :  { %2851 = vmatmul.mubr.f32.vlgmr.msra.gmra.mxu0 %v149_v29  ;;  %2857 = vmatprep.subr.mxu1 %v3037_v0  ;;  %v713_v57 = vand.u32 4294901760, %v712_v52 }
  0x36   :  { %2865 = vmatpush3.msra.mxu0 %v181_v11  ;;  %2858 = vmatpush3.msra.mxu1 %v198_v30  ;;  %v719_v58 = vand.u32 4294901760, %v718_v53  ;;  %v725_v59 = vand.u32 4294901760, %v724_v54  ;;  %v731_v60 = vand.u32 4294901760, %v730_v55  ;;  %v737_v61 = vand.u32 4294901760, %v736_v56  ;;  %v591_v54 = vld [vmem:[#allocation7 + $0xd8] sm:$0xff]  ;;  %v590_v56 = vld [vmem:[#allocation7 + $0xd0] sm:$0xff] }
  0x37   :  { %2866 = vmatprep.subr.mxu0 %v3037_v0  ;;  %2859 = vmatprep.subr.mxu1 %v3037_v0 }
  0x38   :  { %2867 = vmatpush3.msra.mxu0 %v188_v13  ;;  %2860 = vmatpush3.msra.mxu1 %v205_v31 }
  0x39   :  { %2868 = vmatprep.subr.mxu0 %v3037_v0  ;;  %2862 = vmatmul.mubr.f32.vlgmr.msra.gmra.mxu1 %v3098_v12 }
  0x3a   :  { %2869 = vmatpush3.msra.mxu0 %v195_v14  ;;  %2875 = vmatprep.subr.mxu1 %v3037_v0 }
  0x3b   :  { %2870 = vmatprep.subr.mxu0 %v3037_v0  ;;  %2876 = vmatpush3.msra.mxu1 %v3087_v4 }
  0x3c   :  { %2871 = vmatpush3.msra.mxu0 %v202_v15  ;;  %2872 = vmatprep.mubr.msk.f32.mxu0 %vm3038_vm0, %v3037_v0 }
  0x3d   :  { %2877 = vmatprep.subr.mxu1 %v3037_v0  ;;  %2886 = vmatprep.subr.mxu0 %v3037_v0 }
  0x3e   :  { %2873 = vmatmul.mubr.f32.vlgmr.msra.gmra.mxu0 %v146_v17  ;;  %2878 = vmatpush3.msra.mxu1 %v3089_v5 }
  0x3f   :  { %2887 = vmatpush3.msra.mxu0 %v182_v16  ;;  %2879 = vmatprep.subr.mxu1 %v3037_v0  ;;  %v565_v16 = vld [vmem:[#allocation7 + $0x8] sm:$0xff] }
  0x40   :  { %2888 = vmatprep.subr.mxu0 %v3037_v0  ;;  %2880 = vmatpush3.msra.mxu1 %v3091_v6  ;;  %v3205_v17 = vand.u32 4294901760, %v565_v16 }
  0x41   :  { %2889 = vmatpush3.msra.mxu0 %v189_v18  ;;  %2881 = vmatprep.subr.mxu1 %v3037_v0  ;;  %v564_v18 = vld [vmem:[#allocation7] sm:$0xff] }
  0x42   :  { %2890 = vmatprep.subr.mxu0 %v3037_v0  ;;  %2882 = vmatpush3.msra.mxu1 %v3093_v9  ;;  %v3214_v21 = vsub.f32 %v565_v16, %v3205_v17 }
  0x43   :  { %2883 = vmatprep.mubr.msk.f32.mxu1 %vm3038_vm0, %v3037_v0  ;;  %2891 = vmatpush3.msra.mxu0 %v196_v19 }
  0x44   :  { %2884 = vmatmul.mubr.f32.vlgmr.msra.gmra.mxu1 %v147_v22  ;;  %2892 = vmatprep.subr.mxu0 %v3037_v0  ;;  %v747_v26 = vand.u32 4294901760, %v3214_v21 }
  0x45   :  { %2897 = vmatprep.subr.mxu1 %v3037_v0  ;;  %2893 = vmatpush3.msra.mxu0 %v203_v20  ;;  %v3210_v20 = vand.u32 4294901760, %v564_v18 }
  0x46   :  { %2894 = vmatprep.mubr.msk.f32.mxu0 %vm3038_vm0, %v3037_v0  ;;  %2898 = vmatpush3.msra.mxu1 %v3087_v4  ;;  %v748_v31 = vsub.f32 %v3214_v21, %v747_v26 }
  0x47   :  { %2895 = vmatmul.mubr.f32.vlgmr.msra.gmra.mxu0 %v3098_v12  ;;  %2899 = vmatprep.subr.mxu1 %v3037_v0  ;;  %v3219_v24 = vsub.f32 %v564_v18, %v3210_v20 }
  0x48   :  { %2905 = vmatprep.mubr.msk.f32.mxu1 %vm3038_vm0, %v3037_v0  ;;  %2900 = vmatpush3.msra.mxu1 %v3089_v5  ;;  %v749_v38 = vand.u32 4294901760, %v748_v31 }
  0x49   :  { %673 = vmatprep.mubr.f32.mxu0 %v3037_v0  ;;  %2901 = vmatprep.subr.mxu1 %v3037_v0  ;;  %v753_v29 = vand.u32 4294901760, %v3219_v24 }
  0x4a   :  { %2902 = vmatpush3.msra.mxu1 %v3091_v6  ;;  %626 = vmatprep.subr.mxu0 %v3150_v35 }
  0x4b   :  { %2903 = vmatprep.subr.mxu1 %v3037_v0  ;;  %628 = vmatpush1.msra.mxu0 %v3152_v36  ;;  %v754_v34 = vsub.f32 %v3219_v24, %v753_v29 }
  0x4c   :  { %2904 = vmatpush3.msra.mxu1 %v3093_v9  ;;  %630 = vmatprep.subr.mxu0 %v3154_v37 }
  0x4d   :  { %2906 = vmatmul.mubr.f32.vlgmr.msra.gmra.mxu1 %v3098_v12  ;;  %632 = vmatpush1.msra.mxu0 %v3156_v40  ;;  %v572_v12 = vld [vmem:[#allocation7 + $0x40] sm:$0xff]  ;;  %v755_v39 = vand.u32 4294901760, %v754_v34 }
  0x4e   :  { %789 = vmatprep.mubr.f32.mxu1 %v3037_v0  ;;  %634 = vmatprep.subr.mxu0 %v3158_v41  ;;  %v3203_v15 = vand.u32 4294901760, %v572_v12 }
  0x4f   :  { %714 = vmatprep.subr.mxu1 %v713_v57 }
  0x50   :  { %720 = vmatpush1.msra.mxu1 %v719_v58  ;;  %v3208_v19 = vsub.f32 %v572_v12, %v3203_v15  ;;  %636 = vmatpush1.msra.mxu0 %v3203_v15  ;;  %v583_v58 = vld [vmem:[#allocation7 + $0x98] sm:$0xff] }
  0x51   :  { %726 = vmatprep.subr.mxu1 %v725_v59  ;;  %638 = vmatprep.subr.mxu0 %v3205_v17  ;;  %v3239_v59 = vand.u32 4294901760, %v591_v54 }
  0x52   :  { %732 = vmatpush1.msra.mxu1 %v731_v60  ;;  %v741_v23 = vand.u32 4294901760, %v3208_v19  ;;  %640 = vmatpush1.msra.mxu0 %v3210_v20  ;;  %v582_v60 = vld [vmem:[#allocation7 + $0x90] sm:$0xff] }
  0x53   :  { %738 = vmatprep.subr.mxu1 %v737_v61  ;;  %823 = vmatprep.subr.mxu0 %v3161_v42 }
  0x54   :  { %v742_v28 = vsub.f32 %v3208_v19, %v741_v23 }
  0x56   :  { %v743_v33 = vand.u32 4294901760, %v742_v28 }
  0x58   :  { %744 = vmatpush1.msra.mxu1 %v743_v33 }
  0x59   :  { %750 = vmatprep.subr.mxu1 %v749_v38 }
  0x5a   :  { %756 = vmatpush1.msra.mxu1 %v755_v39 }
  0x5b   :  { %911 = vmatprep.subr.mxu1 %v3150_v35 }
  0xf5   :  { %v151_v62 = vpop.f32.mrf.mxu0 }
  0xf6   :  { %v152_v5 = vadd.f32 %v2811_v2, %v151_v62  ;;  %v3245_v62 = vand.u32 4294901760, %v590_v56  ;;  %v574_v2 = vld [vmem:[#allocation7 + $0x50] sm:$0xff] }
  0xf7   :  { %v2852_v63 = vpop.f32.mrf.mxu0 }
  0xf8   :  { %v575_v63 = vld [vmem:[#allocation7 + $0x58] sm:$0xff] }
  0xf9   :  { %v242_v1 = vpop.f32.mrf.mxu1 }
  0xfa   :  { %v243_v7 = vadd.f32 %v242_v1, %v152_v5  ;;  %v3249_v1 = vand.u32 4294901760, %v583_v58  ;;  %v567_v5 = vld [vmem:[#allocation7 + $0x18] sm:$0xff] }
  0xfb   :  { %v2863_v3 = vpop.f32.mrf.mxu1 }
  0xfc   :  { %v3273_v12 = vsub.f32 %v583_v58, %v3249_v1 }
  0xfe   :  { %v322_v4 = vpop.f32.mrf.mxu0 }
  0xff   :  { %v323_v10 = vadd.f32 %v322_v4, %v243_v7  ;;  %v3255_v4 = vand.u32 4294901760, %v582_v60  ;;  %v3261_v7 = vand.u32 4294901760, %v575_v63 }
 0x100   :  { %v2874_v6 = vpop.f32.mrf.mxu0 }
 0x101   :  { %v3259_v6 = vsub.f32 %v591_v54, %v3239_v59  ;;  %v3281_v16 = vsub.f32 %v582_v60, %v3255_v4 }
 0x104   :  { %v399_v8 = vpop.f32.mrf.mxu1 }
 0x105   :  { %v400_v13 = vadd.f32 %v399_v8, %v323_v10  ;;  %v566_v8 = vld [vmem:[#allocation7 + $0x10] sm:$0xff]  ;;  %v3267_v10 = vsub.f32 %v590_v56, %v3245_v62 }
 0x106   :  { %v2885_v9 = vpop.f32.mrf.mxu1  ;;  %v3283_v18 = vand.u32 4294901760, %v566_v8 }
 0x107   :  { %v482_v11 = vpop.f32.mrf.mxu0 }
 0x108   :  { %v483_v22 = vadd.f32 %v482_v11, %v400_v13  ;;  %v3269_v11 = vand.u32 4294901760, %v574_v2  ;;  %v3275_v13 = vand.u32 4294901760, %v567_v5 }
 0x109   :  { %v2896_v14 = vpop.f32.mrf.mxu0 }
 0x10a   :  { %v3294_v28 = vsub.f32 %v574_v2, %v3269_v11  ;;  %v3300_v31 = vsub.f32 %v567_v5, %v3275_v13 }
 0x10c   :  { %v1284_v34 = vand.u32 4294901760, %v3294_v28  ;;  %v1290_v38 = vand.u32 4294901760, %v3300_v31 }
 0x10d   :  { %v557_v25 = vpop.f32.mrf.mxu1 }
 0x10e   :  { %v558_v27 = vadd.f32 %v557_v25, %v483_v22  ;;  %v1254_v22 = vand.u32 4294901760, %v3259_v6  ;;  %v3288_v25 = vsub.f32 %v575_v63, %v3261_v7 }
 0x10f   :  { %v2907_v30 = vpop.f32.mrf.mxu1 }
 0x110   :  { %v562_v32 = vmul.f32 1.442695, %v558_v27  ;;  %561 = vst.msk [vmem:[#allocation8] sm:$0xff] %vm72_vm1, %v558_v27  ;;  %v1260_v27 = vand.u32 4294901760, %v3267_v10  ;;  %v1266_v30 = vand.u32 4294901760, %v3273_v12  ;;  %v1278_v33 = vand.u32 4294901760, %v3288_v25 }
 0x112   :  { %2920 = vpow2.f32 %v562_v32  ;;  %v3306_v32 = vsub.f32 %v566_v8, %v3283_v18 }
 0x114   :  { %v1296_v39 = vand.u32 4294901760, %v3306_v32 }
 0x116   :  { %v1297_v56 = vsub.f32 %v3306_v32, %v1296_v39 }
 0x11f   :  { %v2921_v52 = vpop.eup %2920 }
 0x120   :  { %597 = vrot.lane.b32.xlu0 %v2921_v52, %s3039_s2  ;;  %v1279_v52 = vsub.f32 %v3288_v25, %v1278_v33 }
 0x122   :  { %v1280_v58 = vand.u32 4294901760, %v1279_v52 }
 0x192   :  { %v598_v53 = vpop.permute.xlu0 %597 }
 0x193   :  { %v599_v55 = vsel %vm72_vm1, %v598_v53, 0  ;;  %v1285_v53 = vsub.f32 %v3294_v28, %v1284_v34 }
 0x194   :  { %v3237_v57 = vand.u32 4294901760, %v599_v55 }
 0x195   :  { %v1286_v60 = vand.u32 4294901760, %v1285_v53 }
 0x196   :  { %v3242_v61 = vsub.f32 %v599_v55, %v3237_v57  ;;  %791 = vmatmul.mubr.f32.vlgmr.msra.gmra.mxu1 %v3237_v57  ;;  %v1291_v55 = vsub.f32 %v3300_v31, %v1290_v38 }
 0x197   :  { %913 = vmatpush1.msra.mxu1 %v3152_v36  ;;  %958 = vmatprep.mubr.f32.mxu1 %v3037_v0 }
 0x198   :  { %915 = vmatprep.subr.mxu1 %v3154_v37  ;;  %v3253_v3 = vand.u32 4294901760, %v3242_v61  ;;  %v1292_v42 = vand.u32 4294901760, %v1291_v55 }
 0x199   :  { %917 = vmatpush1.msra.mxu1 %v3156_v40 }
 0x19a   :  { %919 = vmatprep.subr.mxu1 %v3158_v41  ;;  %v677_v9 = vsub.f32 %v3242_v61, %v3253_v3 }
 0x19b   :  { %921 = vmatpush1.msra.mxu1 %v3203_v15 }
 0x19c   :  { %923 = vmatprep.subr.mxu1 %v3205_v17  ;;  %v3278_v14 = vand.u32 4294901760, %v677_v9 }
 0x19d   :  { %925 = vmatpush1.msra.mxu1 %v3210_v20 }
 0x19e   :  { %962 = vmatmul.mubr.f32.vlgmr.msra.gmra.mxu1 %v3253_v3  ;;  %1089 = vmatprep.subr.mxu1 %v3150_v35  ;;  %v1272_v35 = vand.u32 4294901760, %v3281_v16 }
 0x19f   :  { %679 = vmatmul.mubr.f32.vlgmr.msra.gmra.mxu0 %v3278_v14  ;;  %1091 = vmatpush1.msra.mxu1 %v3152_v36  ;;  %v1255_v36 = vsub.f32 %v3259_v6, %v1254_v22 }
 0x1a0   :  { %826 = vmatpush1.msra.mxu0 %v3164_v43  ;;  %1093 = vmatprep.subr.mxu1 %v3154_v37  ;;  %v1261_v37 = vsub.f32 %v3267_v10, %v1260_v27  ;;  %v593_v43 = vld [vmem:[#allocation7 + $0xe8] sm:$0xff] }
 0x1a1   :  { %829 = vmatprep.subr.mxu0 %v3167_v44  ;;  %1095 = vmatpush1.msra.mxu1 %v3156_v40  ;;  %v1267_v40 = vsub.f32 %v3273_v12, %v1266_v30  ;;  %v592_v44 = vld [vmem:[#allocation7 + $0xe0] sm:$0xff] }
 0x1a2   :  { %832 = vmatpush1.msra.mxu0 %v3171_v45  ;;  %1097 = vmatprep.subr.mxu1 %v3158_v41  ;;  %v1273_v41 = vsub.f32 %v3281_v16, %v1272_v35  ;;  %v585_v45 = vld [vmem:[#allocation7 + $0xa8] sm:$0xff] }
 0x1a3   :  { %835 = vmatprep.subr.mxu0 %v3174_v46  ;;  %1099 = vmatpush1.msra.mxu1 %v3203_v15  ;;  %v1256_v15 = vand.u32 4294901760, %v1255_v36  ;;  %v1268_v54 = vand.u32 4294901760, %v1267_v40  ;;  %v3374_v46 = vand.u32 4294901760, %v593_v43 }
 0x1a4   :  { %838 = vmatpush1.msra.mxu0 %v3208_v19  ;;  %1101 = vmatprep.subr.mxu1 %v3205_v17  ;;  %v1262_v17 = vand.u32 4294901760, %v1261_v37  ;;  %v576_v19 = vld [vmem:[#allocation7 + $0x60] sm:$0xff] }
 0x1a5   :  { %841 = vmatprep.subr.mxu0 %v3214_v21  ;;  %877 = vmatprep.mubr.f32.mxu0 %v3037_v0  ;;  %v3400_v2 = vand.u32 4294901760, %v576_v19 }
 0x1a6   :  { %844 = vmatpush1.msra.mxu0 %v3219_v24  ;;  %1103 = vmatpush1.msra.mxu1 %v3210_v20  ;;  %v1274_v20 = vand.u32 4294901760, %v1273_v41  ;;  %v3391_v24 = vsub.f32 %v593_v43, %v3374_v46 }
 0x1a7   :  { %1136 = vmatprep.mubr.f32.mxu1 %v3037_v0  ;;  %880 = vmatmul.mubr.f32.vlgmr.msra.gmra.mxu0 %v3242_v61 }
 0x1a8   :  { %995 = vmatprep.subr.mxu0 %v711_v47  ;;  %1138 = vmatmul.mubr.f32.vlgmr.msra.gmra.mxu1 %v3237_v57  ;;  %v1298_v47 = vand.u32 4294901760, %v1297_v56  ;;  %v1797_v37 = vand.u32 4294901760, %v3391_v24 }
 0x1a9   :  { %1257 = vmatprep.subr.mxu1 %v1256_v15  ;;  %999 = vmatpush1.msra.mxu0 %v717_v48  ;;  %v584_v48 = vld [vmem:[#allocation7 + $0xa0] sm:$0xff]  ;;  %v3426_v15 = vsub.f32 %v576_v19, %v3400_v2 }
 0x1aa   :  { %1263 = vmatpush1.msra.mxu1 %v1262_v17  ;;  %1003 = vmatprep.subr.mxu0 %v723_v49  ;;  %v3378_v49 = vand.u32 4294901760, %v592_v44  ;;  %v3386_v21 = vand.u32 4294901760, %v584_v48 }
 0x1ab   :  { %1269 = vmatprep.subr.mxu1 %v1268_v54  ;;  %1007 = vmatpush1.msra.mxu0 %v729_v50  ;;  %v577_v50 = vld [vmem:[#allocation7 + $0x68] sm:$0xff] }
 0x1ac   :  { %1275 = vmatpush1.msra.mxu1 %v1274_v20  ;;  %1011 = vmatprep.subr.mxu0 %v735_v51  ;;  %v3382_v51 = vand.u32 4294901760, %v585_v45  ;;  %v3398_v63 = vsub.f32 %v592_v44, %v3378_v49  ;;  %v3412_v9 = vsub.f32 %v584_v48, %v3386_v21  ;;  %v1827_v20 = vand.u32 4294901760, %v3426_v15 }
 0x1ad   :  { %1281 = vmatprep.subr.mxu1 %v1280_v58  ;;  %1015 = vmatpush1.msra.mxu0 %v741_v23  ;;  %v569_v23 = vld [vmem:[#allocation7 + $0x28] sm:$0xff] }
 0x1ae   :  { %1287 = vmatpush1.msra.mxu1 %v1286_v60  ;;  %1019 = vmatprep.subr.mxu0 %v747_v26  ;;  %v3393_v26 = vand.u32 4294901760, %v577_v50  ;;  %v3405_v5 = vsub.f32 %v585_v45, %v3382_v51  ;;  %v3407_v8 = vand.u32 4294901760, %v569_v23  ;;  %v1803_v41 = vand.u32 4294901760, %v3398_v63 }
 0x1af   :  { %1293 = vmatprep.subr.mxu1 %v1292_v42  ;;  %1023 = vmatpush1.msra.mxu0 %v753_v29  ;;  %v568_v29 = vld [vmem:[#allocation7 + $0x20] sm:$0xff]  ;;  %v1815_v53 = vand.u32 4294901760, %v3412_v9  ;;  %v1828_v42 = vsub.f32 %v3426_v15, %v1827_v20 }
 0x1b0   :  { %1056 = vmatprep.mubr.f32.mxu0 %v3037_v0  ;;  %1299 = vmatpush1.msra.mxu1 %v1298_v47  ;;  %v3414_v36 = vand.u32 4294901760, %v568_v29  ;;  %v3420_v40 = vsub.f32 %v577_v50, %v3393_v26  ;;  %v1809_v52 = vand.u32 4294901760, %v3405_v5  ;;  %v3432_v17 = vsub.f32 %v569_v23, %v3407_v8 }
 0x1b1   :  { %1332 = vmatprep.mubr.f32.mxu1 %v3037_v0  ;;  %1058 = vmatmul.mubr.f32.vlgmr.msra.gmra.mxu0 %v3237_v57  ;;  %v1829_v45 = vand.u32 4294901760, %v1828_v42 }
 0x1b2   :  { %1169 = vmatprep.subr.mxu0 %v3239_v59  ;;  %1334 = vmatmul.mubr.f32.vlgmr.msra.gmra.mxu1 %v3237_v57  ;;  %v3438_v54 = vsub.f32 %v568_v29, %v3414_v36  ;;  %v1821_v55 = vand.u32 4294901760, %v3420_v40  ;;  %v1833_v56 = vand.u32 4294901760, %v3432_v17 }
 0x1b3   :  { %1454 = vmatprep.subr.mxu1 %v3239_v59  ;;  %1171 = vmatpush1.msra.mxu0 %v3245_v62 }
 0x1b4   :  { %1456 = vmatpush1.msra.mxu1 %v3245_v62  ;;  %1173 = vmatprep.subr.mxu0 %v3249_v1  ;;  %v1839_v58 = vand.u32 4294901760, %v3438_v54  ;;  %v1822_v60 = vsub.f32 %v3420_v40, %v1821_v55  ;;  %v1834_v47 = vsub.f32 %v3432_v17, %v1833_v56 }
 0x1b5   :  { %1458 = vmatprep.subr.mxu1 %v3249_v1  ;;  %1175 = vmatpush1.msra.mxu0 %v3255_v4 }
 0x1b6   :  { %1460 = vmatpush1.msra.mxu1 %v3255_v4  ;;  %1177 = vmatprep.subr.mxu0 %v3261_v7  ;;  %v1840_v43 = vsub.f32 %v3438_v54, %v1839_v58  ;;  %v1823_v44 = vand.u32 4294901760, %v1822_v60 }
 0x1b7   :  { %1462 = vmatprep.subr.mxu1 %v3261_v7  ;;  %1179 = vmatpush1.msra.mxu0 %v3269_v11 }
 0x1b8   :  { %1464 = vmatpush1.msra.mxu1 %v3269_v11  ;;  %1181 = vmatprep.subr.mxu0 %v3275_v13 }
 0x1b9   :  { %1466 = vmatprep.subr.mxu1 %v3275_v13  ;;  %1183 = vmatpush1.msra.mxu0 %v3283_v18 }
 0x1ba   :  { %1216 = vmatprep.mubr.f32.mxu0 %v3037_v0  ;;  %1468 = vmatpush1.msra.mxu1 %v3283_v18 }
 0x1bb   :  { %1501 = vmatprep.mubr.f32.mxu1 %v3037_v0  ;;  %1222 = vmatmul.mubr.f32.vlgmr.msra.gmra.mxu0 %v3278_v14 }
 0x1bc   :  { %1366 = vmatprep.subr.mxu0 %v3259_v6  ;;  %1505 = vmatmul.mubr.f32.vlgmr.msra.gmra.mxu1 %v3253_v3  ;;  %v1835_v6 = vand.u32 4294901760, %v1834_v47 }
 0x1bd   :  { %1632 = vmatprep.subr.mxu1 %v3239_v59  ;;  %1369 = vmatpush1.msra.mxu0 %v3267_v10  ;;  %v1798_v59 = vsub.f32 %v3391_v24, %v1797_v37  ;;  %v595_v10 = vld [vmem:[#allocation7 + $0xf8] sm:$0xff] }
 0x1be   :  { %1634 = vmatpush1.msra.mxu1 %v3245_v62  ;;  %1372 = vmatprep.subr.mxu0 %v3273_v12  ;;  %v1804_v62 = vsub.f32 %v3398_v63, %v1803_v41  ;;  %v594_v12 = vld [vmem:[#allocation7 + $0xf0] sm:$0xff] }
 0x1bf   :  { %1636 = vmatprep.subr.mxu1 %v3249_v1  ;;  %1375 = vmatpush1.msra.mxu0 %v3281_v16  ;;  %v1810_v1 = vsub.f32 %v3405_v5, %v1809_v52  ;;  %v587_v16 = vld [vmem:[#allocation7 + $0xb8] sm:$0xff] }
 0x1c0   :  { %1638 = vmatpush1.msra.mxu1 %v3255_v4  ;;  %1378 = vmatprep.subr.mxu0 %v3288_v25  ;;  %v1816_v4 = vsub.f32 %v3412_v9, %v1815_v53  ;;  %v3506_v25 = vand.u32 4294901760, %v595_v10 }
 0x1c1   :  { %1640 = vmatprep.subr.mxu1 %v3261_v7  ;;  %1381 = vmatpush1.msra.mxu0 %v3294_v28  ;;  %v1799_v7 = vand.u32 4294901760, %v1798_v59  ;;  %v3510_v28 = vand.u32 4294901760, %v594_v12 }
 0x1c2   :  { %1642 = vmatpush1.msra.mxu1 %v3269_v11  ;;  %1384 = vmatprep.subr.mxu0 %v3300_v31  ;;  %v1805_v11 = vand.u32 4294901760, %v1804_v62  ;;  %v3514_v31 = vand.u32 4294901760, %v587_v16 }
 0x1c3   :  { %1644 = vmatprep.subr.mxu1 %v3275_v13  ;;  %1387 = vmatpush1.msra.mxu0 %v3306_v32  ;;  %v1811_v13 = vand.u32 4294901760, %v1810_v1  ;;  %v3530_v48 = vsub.f32 %v594_v12, %v3510_v28 }
 0x1c4   :  { %1420 = vmatprep.mubr.f32.mxu0 %v3037_v0  ;;  %1646 = vmatpush1.msra.mxu1 %v3283_v18  ;;  %v1817_v18 = vand.u32 4294901760, %v1816_v4  ;;  %v3537_v19 = vsub.f32 %v587_v16, %v3514_v31 }
 0x1c5   :  { %1679 = vmatprep.mubr.f32.mxu1 %v3037_v0  ;;  %1423 = vmatmul.mubr.f32.vlgmr.msra.gmra.mxu0 %v3242_v61  ;;  %v2346_v4 = vand.u32 4294901760, %v3530_v48 }
 0x1c6   :  { %1538 = vmatprep.subr.mxu0 %v1254_v22  ;;  %1681 = vmatmul.mubr.f32.vlgmr.msra.gmra.mxu1 %v3237_v57  ;;  %v1841_v22 = vand.u32 4294901760, %v1840_v43  ;;  %v2352_v60 = vand.u32 4294901760, %v3537_v19 }
 0x1c7   :  { %1800 = vmatprep.subr.mxu1 %v1799_v7  ;;  %1542 = vmatpush1.msra.mxu0 %v1260_v27  ;;  %v586_v27 = vld [vmem:[#allocation7 + $0xb0] sm:$0xff] }
 0x1c8   :  { %1806 = vmatpush1.msra.mxu1 %v1805_v11  ;;  %1546 = vmatprep.subr.mxu0 %v1266_v30  ;;  %v579_v30 = vld [vmem:[#allocation7 + $0x78] sm:$0xff]  ;;  %v3518_v32 = vand.u32 4294901760, %v586_v27 }
 0x1c9   :  { %1812 = vmatprep.subr.mxu1 %v1811_v13  ;;  %1550 = vmatpush1.msra.mxu0 %v1272_v35  ;;  %v578_v35 = vld [vmem:[#allocation7 + $0x70] sm:$0xff] }
 0x1ca   :  { %1818 = vmatpush1.msra.mxu1 %v1817_v18  ;;  %1554 = vmatprep.subr.mxu0 %v1278_v33  ;;  %v571_v33 = vld [vmem:[#allocation7 + $0x38] sm:$0xff]  ;;  %v3532_v50 = vand.u32 4294901760, %v578_v35  ;;  %v3544_v29 = vsub.f32 %v586_v27, %v3518_v32 }
 0x1cb   :  { %1824 = vmatprep.subr.mxu1 %v1823_v44  ;;  %1558 = vmatpush1.msra.mxu0 %v1284_v34  ;;  %v3523_v34 = vsub.f32 %v595_v10, %v3506_v25  ;;  %v3539_v23 = vand.u32 4294901760, %v571_v33 }
 0x1cc   :  { %1830 = vmatpush1.msra.mxu1 %v1829_v45  ;;  %1562 = vmatprep.subr.mxu0 %v1290_v38  ;;  %v3525_v38 = vand.u32 4294901760, %v579_v30  ;;  %v3558_v7 = vsub.f32 %v578_v35, %v3532_v50  ;;  %v2358_v42 = vand.u32 4294901760, %v3544_v29 }
 0x1cd   :  { %1836 = vmatprep.subr.mxu1 %v1835_v6  ;;  %1566 = vmatpush1.msra.mxu0 %v1296_v39  ;;  %v570_v39 = vld [vmem:[#allocation7 + $0x30] sm:$0xff]  ;;  %v2340_v62 = vand.u32 4294901760, %v3523_v34  ;;  %v3564_v11 = vsub.f32 %v571_v33, %v3539_v23 }
 0x1ce   :  { %1599 = vmatprep.mubr.f32.mxu0 %v3037_v0  ;;  %1842 = vmatpush1.msra.mxu1 %v1841_v22  ;;  %v3546_v59 = vand.u32 4294901760, %v570_v39  ;;  %v3552_v1 = vsub.f32 %v579_v30, %v3525_v38  ;;  %v2370_v18 = vand.u32 4294901760, %v3558_v7 }
 0x1cf   :  { %1875 = vmatprep.mubr.f32.mxu1 %v3037_v0  ;;  %1601 = vmatmul.mubr.f32.vlgmr.msra.gmra.mxu0 %v3237_v57  ;;  %v2376_v43 = vand.u32 4294901760, %v3564_v11 }
 0x1d0   :  { %1712 = vmatprep.subr.mxu0 %v3374_v46  ;;  %1877 = vmatmul.mubr.f32.vlgmr.msra.gmra.mxu1 %v3237_v57  ;;  %v3570_v13 = vsub.f32 %v570_v39, %v3546_v59  ;;  %v2364_v47 = vand.u32 4294901760, %v3552_v1  ;;  %v2371_v6 = vsub.f32 %v3558_v7, %v2370_v18 }
 0x1d1   :  { %1997 = vmatprep.subr.mxu1 %v3374_v46  ;;  %1714 = vmatpush1.msra.mxu0 %v3378_v49  ;;  %v2377_v22 = vsub.f32 %v3564_v11, %v2376_v43 }
 0x1d2   :  { %1999 = vmatpush1.msra.mxu1 %v3378_v49  ;;  %1716 = vmatprep.subr.mxu0 %v3382_v51  ;;  %v2382_v44 = vand.u32 4294901760, %v3570_v13  ;;  %v2365_v45 = vsub.f32 %v3552_v1, %v2364_v47  ;;  %v2372_v16 = vand.u32 4294901760, %v2371_v6 }
 0x1d3   :  { %2001 = vmatprep.subr.mxu1 %v3382_v51  ;;  %1718 = vmatpush1.msra.mxu0 %v3386_v21 }
 0x1d4   :  { %2003 = vmatpush1.msra.mxu1 %v3386_v21  ;;  %1720 = vmatprep.subr.mxu0 %v3393_v26  ;;  %v2383_v10 = vsub.f32 %v3570_v13, %v2382_v44  ;;  %v2366_v12 = vand.u32 4294901760, %v2365_v45 }
 0x1d5   :  { %2005 = vmatprep.subr.mxu1 %v3393_v26  ;;  %1722 = vmatpush1.msra.mxu0 %v3400_v2 }
 0x1d6   :  { %2007 = vmatpush1.msra.mxu1 %v3400_v2  ;;  %1724 = vmatprep.subr.mxu0 %v3407_v8 }
 0x1d7   :  { %2009 = vmatprep.subr.mxu1 %v3407_v8  ;;  %1726 = vmatpush1.msra.mxu0 %v3414_v36 }
 0x1d8   :  { %1759 = vmatprep.mubr.f32.mxu0 %v3037_v0  ;;  %2011 = vmatpush1.msra.mxu1 %v3414_v36 }
 0x1d9   :  { %2044 = vmatprep.mubr.f32.mxu1 %v3037_v0  ;;  %1765 = vmatmul.mubr.f32.vlgmr.msra.gmra.mxu0 %v3278_v14 }
 0x1da   :  { %1909 = vmatprep.subr.mxu0 %v3391_v24  ;;  %2048 = vmatmul.mubr.f32.vlgmr.msra.gmra.mxu1 %v3253_v3  ;;  %v2378_v24 = vand.u32 4294901760, %v2377_v22 }
 0x1db   :  { %2175 = vmatprep.subr.mxu1 %v3374_v46  ;;  %1912 = vmatpush1.msra.mxu0 %v3398_v63  ;;  %v2341_v46 = vsub.f32 %v3523_v34, %v2340_v62 }
 0x1dc   :  { %2177 = vmatpush1.msra.mxu1 %v3378_v49  ;;  %1915 = vmatprep.subr.mxu0 %v3405_v5  ;;  %v2347_v49 = vsub.f32 %v3530_v48, %v2346_v4 }
 0x1dd   :  { %2179 = vmatprep.subr.mxu1 %v3382_v51  ;;  %1918 = vmatpush1.msra.mxu0 %v3412_v9  ;;  %v2353_v51 = vsub.f32 %v3537_v19, %v2352_v60 }
 0x1de   :  { %2181 = vmatpush1.msra.mxu1 %v3386_v21  ;;  %1921 = vmatprep.subr.mxu0 %v3420_v40  ;;  %v2359_v21 = vsub.f32 %v3544_v29, %v2358_v42 }
 0x1df   :  { %2183 = vmatprep.subr.mxu1 %v3393_v26  ;;  %1924 = vmatpush1.msra.mxu0 %v3426_v15  ;;  %v2342_v26 = vand.u32 4294901760, %v2341_v46 }
 0x1e0   :  { %2185 = vmatpush1.msra.mxu1 %v3400_v2  ;;  %1927 = vmatprep.subr.mxu0 %v3432_v17  ;;  %v2348_v2 = vand.u32 4294901760, %v2347_v49 }
 0x1e1   :  { %2187 = vmatprep.subr.mxu1 %v3407_v8  ;;  %1930 = vmatpush1.msra.mxu0 %v3438_v54  ;;  %v2354_v8 = vand.u32 4294901760, %v2353_v51 }
 0x1e2   :  { %1963 = vmatprep.mubr.f32.mxu0 %v3037_v0  ;;  %2189 = vmatpush1.msra.mxu1 %v3414_v36  ;;  %v2360_v36 = vand.u32 4294901760, %v2359_v21 }
 0x1e3   :  { %2222 = vmatprep.mubr.f32.mxu1 %v3037_v0  ;;  %1966 = vmatmul.mubr.f32.vlgmr.msra.gmra.mxu0 %v3242_v61 }
 0x1e4   :  { %2081 = vmatprep.subr.mxu0 %v1797_v37  ;;  %2224 = vmatmul.mubr.f32.vlgmr.msra.gmra.mxu1 %v3237_v57  ;;  %v2384_v37 = vand.u32 4294901760, %v2383_v10 }
 0x1e5   :  { %2343 = vmatprep.subr.mxu1 %v2342_v26  ;;  %2085 = vmatpush1.msra.mxu0 %v1803_v41 }
 0x1e6   :  { %2349 = vmatpush1.msra.mxu1 %v2348_v2  ;;  %2089 = vmatprep.subr.mxu0 %v1809_v52 }
 0x1e7   :  { %2355 = vmatprep.subr.mxu1 %v2354_v8  ;;  %2093 = vmatpush1.msra.mxu0 %v1815_v53 }
 0x1e8   :  { %2361 = vmatpush1.msra.mxu1 %v2360_v36  ;;  %2097 = vmatprep.subr.mxu0 %v1821_v55 }
 0x1e9   :  { %2367 = vmatprep.subr.mxu1 %v2366_v12  ;;  %2101 = vmatpush1.msra.mxu0 %v1827_v20 }
 0x1ea   :  { %2373 = vmatpush1.msra.mxu1 %v2372_v16  ;;  %2105 = vmatprep.subr.mxu0 %v1833_v56 }
 0x1eb   :  { %2379 = vmatprep.subr.mxu1 %v2378_v24  ;;  %2109 = vmatpush1.msra.mxu0 %v1839_v58 }
 0x1ec   :  { %2142 = vmatprep.mubr.f32.mxu0 %v3037_v0  ;;  %2385 = vmatpush1.msra.mxu1 %v2384_v37 }
 0x1ed   :  { %2418 = vmatprep.mubr.f32.mxu1 %v3037_v0  ;;  %2144 = vmatmul.mubr.f32.vlgmr.msra.gmra.mxu0 %v3237_v57 }
 0x1ee   :  { %2255 = vmatprep.subr.mxu0 %v3506_v25  ;;  %2420 = vmatmul.mubr.f32.vlgmr.msra.gmra.mxu1 %v3237_v57 }
 0x1ef   :  { %2540 = vmatprep.subr.mxu1 %v3506_v25  ;;  %2257 = vmatpush1.msra.mxu0 %v3510_v28 }
 0x1f0   :  { %2542 = vmatpush1.msra.mxu1 %v3510_v28  ;;  %2259 = vmatprep.subr.mxu0 %v3514_v31 }
 0x1f1   :  { %2544 = vmatprep.subr.mxu1 %v3514_v31  ;;  %2261 = vmatpush1.msra.mxu0 %v3518_v32 }
 0x1f2   :  { %2546 = vmatpush1.msra.mxu1 %v3518_v32  ;;  %2263 = vmatprep.subr.mxu0 %v3525_v38 }
 0x1f3   :  { %2548 = vmatprep.subr.mxu1 %v3525_v38  ;;  %2265 = vmatpush1.msra.mxu0 %v3532_v50 }
 0x1f4   :  { %2550 = vmatpush1.msra.mxu1 %v3532_v50  ;;  %2267 = vmatprep.subr.mxu0 %v3539_v23 }
 0x1f5   :  { %2552 = vmatprep.subr.mxu1 %v3539_v23  ;;  %2269 = vmatpush1.msra.mxu0 %v3546_v59 }
 0x1f6   :  { %2302 = vmatprep.mubr.f32.mxu0 %v3037_v0  ;;  %2554 = vmatpush1.msra.mxu1 %v3546_v59 }
 0x1f7   :  { %2587 = vmatprep.mubr.f32.mxu1 %v3037_v0  ;;  %2308 = vmatmul.mubr.f32.vlgmr.msra.gmra.mxu0 %v3278_v14 }
 0x1f8   :  { %2452 = vmatprep.subr.mxu0 %v3523_v34  ;;  %2591 = vmatmul.mubr.f32.vlgmr.msra.gmra.mxu1 %v3253_v3 }
 0x1f9   :  { %2718 = vmatprep.subr.mxu1 %v3506_v25  ;;  %2455 = vmatpush1.msra.mxu0 %v3530_v48 }
 0x1fa   :  { %2720 = vmatpush1.msra.mxu1 %v3510_v28  ;;  %2458 = vmatprep.subr.mxu0 %v3537_v19 }
 0x1fb   :  { %2722 = vmatprep.subr.mxu1 %v3514_v31  ;;  %2461 = vmatpush1.msra.mxu0 %v3544_v29 }
 0x1fc   :  { %2724 = vmatpush1.msra.mxu1 %v3518_v32  ;;  %2464 = vmatprep.subr.mxu0 %v3552_v1 }
 0x1fd   :  { %2726 = vmatprep.subr.mxu1 %v3525_v38  ;;  %2467 = vmatpush1.msra.mxu0 %v3558_v7 }
 0x1fe   :  { %2728 = vmatpush1.msra.mxu1 %v3532_v50  ;;  %2470 = vmatprep.subr.mxu0 %v3564_v11 }
 0x1ff   :  { %2730 = vmatprep.subr.mxu1 %v3539_v23  ;;  %2473 = vmatpush1.msra.mxu0 %v3570_v13 }
 0x200   :  { %2506 = vmatprep.mubr.f32.mxu0 %v3037_v0  ;;  %2732 = vmatpush1.msra.mxu1 %v3546_v59 }
 0x201   :  { %2765 = vmatprep.mubr.f32.mxu1 %v3037_v0  ;;  %2509 = vmatmul.mubr.f32.vlgmr.msra.gmra.mxu0 %v3242_v61 }
 0x202   :  { %2624 = vmatprep.subr.mxu0 %v2340_v62  ;;  %2767 = vmatmul.mubr.f32.vlgmr.msra.gmra.mxu1 %v3237_v57 }
 0x203   :  { %2628 = vmatpush1.msra.mxu0 %v2346_v4  ;;  %2685 = vmatprep.mubr.f32.mxu0 %v3037_v0 }
 0x204   :  { %2632 = vmatprep.subr.mxu0 %v2352_v60 }
 0x205   :  { %2636 = vmatpush1.msra.mxu0 %v2358_v42 }
 0x206   :  { %2640 = vmatprep.subr.mxu0 %v2364_v47 }
 0x207   :  { %2644 = vmatpush1.msra.mxu0 %v2370_v18 }
 0x208   :  { %2648 = vmatprep.subr.mxu0 %v2376_v43 }
 0x209   :  { %2652 = vmatpush1.msra.mxu0 %v2382_v44 }
 0x20a   :  { %2687 = vmatmul.mubr.f32.vlgmr.msra.gmra.mxu0 %v3237_v57 }
 0x20b   :  { %2993 = shalt.err (!%p2990_p5)
}
 0x20c   :  { %2790 = dma.vmem_to_hbm [thread:$0]  %s2788_s12, 128, %s3703_s4, [#allocation4]  }
 0x20d   :  { %s3041_s4 = smov [#allocation9]  }
 0x20e   :  { %s2797_s16 = sshll.u32 %s3041_s4, 4  ;;  %s2798_s16 = int_to_ptr.vmem [resolvable:$true] %s2797_s16 }
 0x20f   :  { %s3002_s17 = scalar_lea.vmem %s2798_s16, 1024  ;;  %p3007_p7 = scmp.lt.s32.totalorder %s2798_s16, %s2798_s16 }
 0x210   :  { %p3003_p6 = scmp.ne.s32.totalorder %s2798_s16, %s3002_s17  ;;  %p3008_p8 = scmp.lt.s32.totalorder %s3002_s17, %s3002_s17 }
 0x212   :  { %p3009_p9 = por %p3008_p8, %p3007_p7 }
 0x214   :  { %p3010_p10 = pnand %p3009_p9, %p3003_p6 }
 0x256   :  { %v792_v61 = vpop.f32.mrf.mxu1 }
 0x258   :  { %v794_v63 = vpop.f32.mrf.mxu1 }
 0x25e   :  { %v963_v5 = vpop.f32.mrf.mxu1 }
 0x25f   :  { %v680_v0 = vpop.f32.mrf.mxu0 }
 0x260   :  { %v793_v57 = vadd.f32 %v792_v61, %v680_v0  ;;  %v965_v52 = vpop.f32.mrf.mxu1 }
 0x261   :  { %v682_v3 = vpop.f32.mrf.mxu0 }
 0x262   :  { %v795_v40 = vadd.f32 %v794_v63, %v682_v3 }
 0x267   :  { %v881_v14 = vpop.f32.mrf.mxu0 }
 0x268   :  { %v882_v41 = vadd.f32 %v881_v14, %v793_v57  ;;  %v1139_v53 = vpop.f32.mrf.mxu1 }
 0x269   :  { %v883_v9 = vpop.f32.mrf.mxu0 }
 0x26a   :  { %v884_v15 = vadd.f32 %v883_v9, %v795_v40  ;;  %v964_v17 = vadd.f32 %v963_v5, %v882_v41  ;;  %v1141_v27 = vpop.f32.mrf.mxu1 }
 0x26c   :  { %v966_v20 = vadd.f32 %v965_v52, %v884_v15 }
 0x271   :  { %v1059_v54 = vpop.f32.mrf.mxu0 }
 0x272   :  { %v1060_v55 = vadd.f32 %v1059_v54, %v964_v17  ;;  %v1335_v31 = vpop.f32.mrf.mxu1 }
 0x273   :  { %v1061_v56 = vpop.f32.mrf.mxu0 }
 0x274   :  { %v1140_v58 = vadd.f32 %v1139_v53, %v1060_v55  ;;  %v1062_v25 = vadd.f32 %v1061_v56, %v966_v20  ;;  %v1337_v33 = vpop.f32.mrf.mxu1 }
 0x276   :  { %2773 = vst [vmem:[#allocation9] sm:$0xff] %v1140_v58  ;;  %v1142_v28 = vadd.f32 %v1141_v27, %v1062_v25 }
 0x278   :  { %2774 = vst [vmem:[#allocation9 + $0x8] sm:$0xff] %v1142_v28 }
 0x27b   :  { %v1223_v30 = vpop.f32.mrf.mxu0 }
 0x27c   :  { %v1336_v34 = vadd.f32 %v1335_v31, %v1223_v30  ;;  %v1506_v38 = vpop.f32.mrf.mxu1 }
 0x27d   :  { %v1225_v35 = vpop.f32.mrf.mxu0 }
 0x27e   :  { %v1338_v48 = vadd.f32 %v1337_v33, %v1225_v35  ;;  %v1508_v23 = vpop.f32.mrf.mxu1 }
 0x285   :  { %v1424_v32 = vpop.f32.mrf.mxu0 }
 0x286   :  { %v1425_v50 = vadd.f32 %v1424_v32, %v1336_v34  ;;  %v1682_v59 = vpop.f32.mrf.mxu1 }
 0x287   :  { %v1426_v39 = vpop.f32.mrf.mxu0 }
 0x288   :  { %v1427_v19 = vadd.f32 %v1426_v39, %v1338_v48  ;;  %v1507_v29 = vadd.f32 %v1506_v38, %v1425_v50  ;;  %v1684_v42 = vpop.f32.mrf.mxu1 }
 0x28a   :  { %v1509_v4 = vadd.f32 %v1508_v23, %v1427_v19 }
 0x28f   :  { %v1602_v62 = vpop.f32.mrf.mxu0 }
 0x290   :  { %v1603_v1 = vadd.f32 %v1602_v62, %v1507_v29  ;;  %v1878_v47 = vpop.f32.mrf.mxu1 }
 0x291   :  { %v1604_v7 = vpop.f32.mrf.mxu0 }
 0x292   :  { %v1683_v60 = vadd.f32 %v1682_v59, %v1603_v1  ;;  %v1605_v11 = vadd.f32 %v1604_v7, %v1509_v4  ;;  %v1880_v51 = vpop.f32.mrf.mxu1 }
 0x294   :  { %2775 = vst [vmem:[#allocation9 + $0x10] sm:$0xff] %v1683_v60  ;;  %v1685_v13 = vadd.f32 %v1684_v42, %v1605_v11 }
 0x296   :  { %2776 = vst [vmem:[#allocation9 + $0x18] sm:$0xff] %v1685_v13 }
 0x299   :  { %v1766_v46 = vpop.f32.mrf.mxu0 }
 0x29a   :  { %v1879_v43 = vadd.f32 %v1878_v47, %v1766_v46  ;;  %v2049_v21 = vpop.f32.mrf.mxu1 }
 0x29b   :  { %v1768_v49 = vpop.f32.mrf.mxu0 }
 0x29c   :  { %v1881_v26 = vadd.f32 %v1880_v51, %v1768_v49  ;;  %v2051_v6 = vpop.f32.mrf.mxu1 }
 0x2a3   :  { %v1967_v18 = vpop.f32.mrf.mxu0 }
 0x2a4   :  { %v1968_v45 = vadd.f32 %v1967_v18, %v1879_v43  ;;  %v2225_v22 = vpop.f32.mrf.mxu1 }
 0x2a5   :  { %v1969_v44 = vpop.f32.mrf.mxu0 }
 0x2a6   :  { %v1970_v2 = vadd.f32 %v1969_v44, %v1881_v26  ;;  %v2050_v8 = vadd.f32 %v2049_v21, %v1968_v45  ;;  %v2227_v0 = vpop.f32.mrf.mxu1 }
 0x2a8   :  { %v2052_v12 = vadd.f32 %v2051_v6, %v1970_v2 }
 0x2ad   :  { %v2145_v36 = vpop.f32.mrf.mxu0 }
 0x2ae   :  { %v2146_v10 = vadd.f32 %v2145_v36, %v2050_v8  ;;  %v2421_v14 = vpop.f32.mrf.mxu1 }
 0x2af   :  { %v2147_v16 = vpop.f32.mrf.mxu0 }
 0x2b0   :  { %v2226_v24 = vadd.f32 %v2225_v22, %v2146_v10  ;;  %v2148_v37 = vadd.f32 %v2147_v16, %v2052_v12  ;;  %v2423_v5 = vpop.f32.mrf.mxu1 }
 0x2b2   :  { %2777 = vst [vmem:[#allocation9 + $0x20] sm:$0xff] %v2226_v24  ;;  %v2228_v61 = vadd.f32 %v2227_v0, %v2148_v37 }
 0x2b4   :  { %2778 = vst [vmem:[#allocation9 + $0x28] sm:$0xff] %v2228_v61 }
 0x2b7   :  { %v2309_v3 = vpop.f32.mrf.mxu0 }
 0x2b8   :  { %v2422_v9 = vadd.f32 %v2421_v14, %v2309_v3  ;;  %v2592_v40 = vpop.f32.mrf.mxu1 }
 0x2b9   :  { %v2311_v63 = vpop.f32.mrf.mxu0 }
 0x2ba   :  { %v2424_v15 = vadd.f32 %v2423_v5, %v2311_v63  ;;  %v2594_v53 = vpop.f32.mrf.mxu1 }
 0x2c1   :  { %v2510_v57 = vpop.f32.mrf.mxu0 }
 0x2c2   :  { %v2511_v52 = vadd.f32 %v2510_v57, %v2422_v9  ;;  %v2768_v55 = vpop.f32.mrf.mxu1 }
 0x2c3   :  { %v2512_v41 = vpop.f32.mrf.mxu0 }
 0x2c4   :  { %v2513_v17 = vadd.f32 %v2512_v41, %v2424_v15  ;;  %v2593_v54 = vadd.f32 %v2592_v40, %v2511_v52  ;;  %v2770_v30 = vpop.f32.mrf.mxu1 }
 0x2c6   :  { %v2595_v58 = vadd.f32 %v2594_v53, %v2513_v17 }
 0x2ca   :  { %v2688_v20 = vpop.f32.mrf.mxu0 }
 0x2cb   :  { %v2689_v56 = vadd.f32 %v2688_v20, %v2593_v54 }
 0x2cc   :  { %v2690_v25 = vpop.f32.mrf.mxu0 }
 0x2cd   :  { %v2769_v27 = vadd.f32 %v2768_v55, %v2689_v56  ;;  %v2691_v28 = vadd.f32 %v2690_v25, %v2595_v58 }
 0x2cf   :  { %2779 = vst [vmem:[#allocation9 + $0x30] sm:$0xff] %v2769_v27  ;;  %v2771_v31 = vadd.f32 %v2770_v30, %v2691_v28 }
 0x2d1   :  { %2780 = vst [vmem:[#allocation9 + $0x38] sm:$0xff] %v2771_v31 }
 0x2d2   :  { %3013 = shalt.err (!%p3010_p10)
}
 0x2d3   :  { %2800 = dma.vmem_to_hbm [thread:$0]  %s2798_s16, 1024, %s3704_s5, [#allocation10]  }
 0x2d4   :  { %3026 = dma.done.wait [#allocation4], 128  }
 0x2d5   :  { %3027 = vsyncadd [#allocation4], 4294967168 }
 0x2d6   :  { %3028 = dma.done.wait [#allocation10], 1024  }
 0x2d7   :  { %3029 = vsyncadd [#allocation10], 4294966272 }
 0x2d8   :  { %2807 = vsyncpa [#allocation3], 1 }
 0x2d9   :  { %2808 = vsyncpa [#allocation6], 1 }
 0x2da   :  { %2809 = vsyncpa [#allocation4], 1 }
 0x2db   :  { %2810 = vsyncpa [#allocation10], 1 }

// kernel: tpu_custom_call.1
= control target key start
LH: loop header
LB: loop body
LE: loop exit
PB: predicated region body
PF: predicated region fallthrough
CT: control target
= control target key end

     0   :  { %11 = vsyncpa [#allocation3], 0  ;;  %s3699_s0 = inlined_call_operand.hbm [shape: f32[8,32], index: 0, kind: input, shape index: {}]   ;;  %s3700_s1 = inlined_call_operand.hbm [shape: f32[32,64], index: 1, kind: input, shape index: {}]   ;;  %s3701_s2 = inlined_call_operand.vmem [shape: f32[1,64], index: 2, kind: input, shape index: {}]   ;;  %s3702_s3 = inlined_call_operand.hbm [shape: f32[32,1024], index: 3, kind: input, shape index: {}]   ;;  %s3703_s4 = inlined_call_operand.hbm [shape: f32[8,32], index: 4, kind: output, shape index: {0}]   ;;  %s3704_s5 = inlined_call_operand.hbm [shape: f32[8,1024], index: 5, kind: output, shape index: {1}]  }
   0x1   :  { %12 = vsyncpa [#allocation6], 0 }
   0x2   :  { %13 = vsyncpa [#allocation4], 0 }
   0x3   :  { %14 = vsyncpa [#allocation10], 0  ;;  %s3030_s18 = smov [#allocation5]  }
   0x4   :  { %s30_s19 = sshll.u32 %s3030_s18, 4  ;;  %s31_s19 = int_to_ptr.vmem [resolvable:$true] %s30_s19 }
   0x5   :  { %s2930_s20 = scalar_lea.vmem %s31_s19, 512  ;;  %p2935_p1 = scmp.lt.s32.totalorder %s31_s19, %s31_s19 }
   0x6   :  { %p2931_p0 = scmp.ne.s32.totalorder %s31_s19, %s2930_s20  ;;  %p2936_p2 = scmp.lt.s32.totalorder %s2930_s20, %s2930_s20 }
   0x8   :  { %p2937_p3 = por %p2936_p2, %p2935_p1 }
   0xa   :  { %p2938_p4 = pnand %p2937_p3, %p2931_p0 }
   0xc   :  { %2941 = shalt.err (!%p2938_p4)
}
   0xd   :  { %s3031_s21 = smov 128   ;;  %s3032_s22 = smov 8  }
   0xe   :  { %36 = dma.hbm_to_vmem [thread:$0]  %s3700_s1, 512, %s31_s19, [#allocation6], %s3031_s21, %s3031_s21, %s3032_s22  }
   0xf   :  { %s3033_s25 = smov [#allocation2]   ;;  %s3034_s27 = smov [#allocation7]  }
  0x10   :  { %s21_s26 = sshll.u32 %s3033_s25, 4  ;;  %s44_s28 = sshll.u32 %s3034_s27, 4  ;;  %s22_s26 = int_to_ptr.vmem [resolvable:$true] %s21_s26  ;;  %s45_s28 = int_to_ptr.vmem [resolvable:$true] %s44_s28 }
  0x11   :  { %s2950_s29 = scalar_lea.vmem %s22_s26, 128  ;;  %p2955_p6 = scmp.lt.s32.totalorder %s22_s26, %s22_s26 }
  0x12   :  { %p2951_p5 = scmp.ne.s32.totalorder %s22_s26, %s2950_s29  ;;  %p2956_p7 = scmp.lt.s32.totalorder %s2950_s29, %s2950_s29 }
  0x14   :  { %p2957_p8 = por %p2956_p7, %p2955_p6 }
  0x16   :  { %p2958_p9 = pnand %p2957_p8, %p2951_p5 }
  0x18   :  { %2961 = shalt.err (!%p2958_p9)
}
  0x19   :  { %24 = dma.hbm_to_vmem [thread:$0]  %s3699_s0, 128, %s22_s26, [#allocation3]  }
  0x1a   :  { %s2970_s7 = scalar_lea.vmem %s45_s28, 4096  ;;  %p2975_p11 = scmp.lt.s32.totalorder %s45_s28, %s45_s28 }
  0x1b   :  { %p2971_p10 = scmp.ne.s32.totalorder %s45_s28, %s2970_s7  ;;  %p2976_p12 = scmp.lt.s32.totalorder %s2970_s7, %s2970_s7 }
  0x1d   :  { %p2977_p13 = por %p2976_p12, %p2975_p11 }
  0x1f   :  { %p2978_p0 = pnand %p2977_p13, %p2971_p10 }
  0x21   :  { %2981 = shalt.err (!%p2978_p0)
}
  0x22   :  { %s3035_s1 = smov 1024   ;;  %s3036_s8 = smov 64  }
  0x23   :  { %50 = dma.hbm_to_vmem [thread:$0]  %s3702_s3, 4096, %s45_s28, [#allocation6], %s3035_s1, %s3035_s1, %s3036_s8  }
  0x24   :  { %3022 = dma.done.wait [#allocation3], 128  }
  0x25   :  { %3023 = vsyncadd [#allocation3], 4294967168 }
  0x26   :  { %3024 = dma.done.wait [#allocation6], 4608  }
  0x27   :  { %3025 = vsyncadd [#allocation6], 4294962688  ;;  %v3037_v0 = vmov 0.0   ;;  %vm3038_vm0 = vmmov 0   ;;  %vm72_vm1 = vcmask 261120   ;;  %v64_v1 = vld [vmem:[#allocation5 + $0x18] sm:$0xff] }
  0x28   :  { %2842 = vmatprep.subr.mxu0 %v3037_v0  ;;  %2853 = vmatprep.subr.mxu1 %v3037_v0  ;;  %v63_v2 = vld [vmem:[#allocation5 + $0x10] sm:$0xff]  ;;  %v62_v3 = vld [vmem:[#allocation5 + $0x8] sm:$0xff]  ;;  %v3087_v4 = vand.u32 4294901760, %v64_v1  ;;  %v61_v7 = vld [vmem:[#allocation5] sm:$0xff]  ;;  %s3040_s11 = smov [#allocation8]  }
  0x29   :  { %2850 = vmatprep.mubr.msk.f32.mxu0 %vm3038_vm0, %v3037_v0  ;;  %2861 = vmatprep.mubr.msk.f32.mxu1 %vm3038_vm0, %v3037_v0  ;;  %v3089_v5 = vand.u32 4294901760, %v63_v2  ;;  %v3091_v6 = vand.u32 4294901760, %v62_v3  ;;  %v60_v8 = vld [vmem:[#allocation2] sm:$0xff]  ;;  %v3093_v9 = vand.u32 4294901760, %v61_v7  ;;  %v589_v32 = vld [vmem:[#allocation7 + $0xc8] sm:$0xff]  ;;  %v588_v33 = vld [vmem:[#allocation7 + $0xc0] sm:$0xff] }
  0x2a   :  { %v74_v10 = vsel %vm72_vm1, %v60_v8, 0  ;;  %2843 = vmatpush3.msra.mxu0 %v3087_v4  ;;  %v181_v11 = vsub.f32 %v64_v1, %v3087_v4  ;;  %v581_v34 = vld [vmem:[#allocation7 + $0x88] sm:$0xff]  ;;  %v3150_v35 = vand.u32 4294901760, %v589_v32  ;;  %v3152_v36 = vand.u32 4294901760, %v588_v33  ;;  %v580_v38 = vld [vmem:[#allocation7 + $0x80] sm:$0xff]  ;;  %s2787_s12 = sshll.u32 %s3040_s11, 4  ;;  %s2788_s12 = int_to_ptr.vmem [resolvable:$true] %s2787_s12 }
  0x2b   :  { %v3098_v12 = vand.u32 4294901760, %v74_v10  ;;  %v188_v13 = vsub.f32 %v63_v2, %v3089_v5  ;;  %v195_v14 = vsub.f32 %v62_v3, %v3091_v6  ;;  %2844 = vmatprep.subr.mxu0 %v3037_v0  ;;  %v202_v15 = vsub.f32 %v61_v7, %v3093_v9  ;;  %v573_v39 = vld [vmem:[#allocation7 + $0x48] sm:$0xff]  ;;  %v2811_v2 = vld [vmem:[%s3701_s2] ss:$0 sm:$0xff]  ;;  %s3039_s2 = smov 96   ;;  %s2982_s13 = scalar_lea.vmem %s2788_s12, 128 }
  0x2c   :  { %2845 = vmatpush3.msra.mxu0 %v3089_v5  ;;  %v182_v16 = vand.u32 4294901760, %v181_v11  ;;  %v3154_v37 = vand.u32 4294901760, %v581_v34  ;;  %v3156_v40 = vand.u32 4294901760, %v580_v38  ;;  %v3158_v41 = vand.u32 4294901760, %v573_v39  ;;  %p2983_p1 = scmp.ne.s32.totalorder %s2788_s12, %s2982_s13  ;;  %p2987_p2 = scmp.lt.s32.totalorder %s2788_s12, %s2788_s12 }
  0x2d   :  { %v146_v17 = vsub.f32 %v74_v10, %v3098_v12  ;;  %v189_v18 = vand.u32 4294901760, %v188_v13  ;;  %v196_v19 = vand.u32 4294901760, %v195_v14  ;;  %2846 = vmatprep.subr.mxu0 %v3037_v0  ;;  %v203_v20 = vand.u32 4294901760, %v202_v15  ;;  %p2988_p3 = scmp.lt.s32.totalorder %s2982_s13, %s2982_s13 }
  0x2e   :  { %2847 = vmatpush3.msra.mxu0 %v3091_v6  ;;  %v183_v21 = vsub.f32 %v181_v11, %v182_v16  ;;  %v3161_v42 = vsub.f32 %v589_v32, %v3150_v35  ;;  %v3164_v43 = vsub.f32 %v588_v33, %v3152_v36  ;;  %v3167_v44 = vsub.f32 %v581_v34, %v3154_v37 }
  0x2f   :  { %v147_v22 = vand.u32 4294901760, %v146_v17  ;;  %v190_v23 = vsub.f32 %v188_v13, %v189_v18  ;;  %v197_v24 = vsub.f32 %v195_v14, %v196_v19  ;;  %2848 = vmatprep.subr.mxu0 %v3037_v0  ;;  %v204_v28 = vsub.f32 %v202_v15, %v203_v20  ;;  %p2989_p4 = por %p2988_p3, %p2987_p2 }
  0x30   :  { %2849 = vmatpush3.msra.mxu0 %v3093_v9  ;;  %v184_v25 = vand.u32 4294901760, %v183_v21  ;;  %v3171_v45 = vsub.f32 %v580_v38, %v3156_v40  ;;  %v3174_v46 = vsub.f32 %v573_v39, %v3158_v41  ;;  %v711_v47 = vand.u32 4294901760, %v3161_v42 }
  0x31   :  { %v148_v26 = vsub.f32 %v146_v17, %v147_v22  ;;  %v191_v27 = vand.u32 4294901760, %v190_v23  ;;  %2864 = vmatprep.subr.mxu0 %v3037_v0  ;;  %v198_v30 = vand.u32 4294901760, %v197_v24  ;;  %v205_v31 = vand.u32 4294901760, %v204_v28  ;;  %p2990_p5 = pnand %p2989_p4, %p2983_p1 }
  0x32   :  { %2854 = vmatpush3.msra.mxu1 %v184_v25  ;;  %v717_v48 = vand.u32 4294901760, %v3164_v43  ;;  %v723_v49 = vand.u32 4294901760, %v3167_v44  ;;  %v729_v50 = vand.u32 4294901760, %v3171_v45  ;;  %v735_v51 = vand.u32 4294901760, %v3174_v46 }
  0x33   :  { %v149_v29 = vand.u32 4294901760, %v148_v26  ;;  %2855 = vmatprep.subr.mxu1 %v3037_v0  ;;  %v712_v52 = vsub.f32 %v3161_v42, %v711_v47 }
  0x34   :  { %2856 = vmatpush3.msra.mxu1 %v191_v27  ;;  %v718_v53 = vsub.f32 %v3164_v43, %v717_v48  ;;  %v724_v54 = vsub.f32 %v3167_v44, %v723_v49  ;;  %v730_v55 = vsub.f32 %v3171_v45, %v729_v50  ;;  %v736_v56 = vsub.f32 %v3174_v46, %v735_v51 }
  0x35   :  { %2851 = vmatmul.mubr.f32.vlgmr.msra.gmra.mxu0 %v149_v29  ;;  %2857 = vmatprep.subr.mxu1 %v3037_v0  ;;  %v713_v57 = vand.u32 4294901760, %v712_v52 }
  0x36   :  { %2865 = vmatpush3.msra.mxu0 %v181_v11  ;;  %2858 = vmatpush3.msra.mxu1 %v198_v30  ;;  %v719_v58 = vand.u32 4294901760, %v718_v53  ;;  %v725_v59 = vand.u32 4294901760, %v724_v54  ;;  %v731_v60 = vand.u32 4294901760, %v730_v55  ;;  %v737_v61 = vand.u32 4294901760, %v736_v56  ;;  %v591_v54 = vld [vmem:[#allocation7 + $0xd8] sm:$0xff]  ;;  %v590_v56 = vld [vmem:[#allocation7 + $0xd0] sm:$0xff] }
  0x37   :  { %2866 = vmatprep.subr.mxu0 %v3037_v0  ;;  %2859 = vmatprep.subr.mxu1 %v3037_v0 }
  0x38   :  { %2867 = vmatpush3.msra.mxu0 %v188_v13  ;;  %2860 = vmatpush3.msra.mxu1 %v205_v31 }
  0x39   :  { %2868 = vmatprep.subr.mxu0 %v3037_v0  ;;  %2862 = vmatmul.mubr.f32.vlgmr.msra.gmra.mxu1 %v3098_v12 }
  0x3a   :  { %2869 = vmatpush3.msra.mxu0 %v195_v14  ;;  %2875 = vmatprep.subr.mxu1 %v3037_v0 }
  0x3b   :  { %2870 = vmatprep.subr.mxu0 %v3037_v0  ;;  %2876 = vmatpush3.msra.mxu1 %v3087_v4 }
  0x3c   :  { %2871 = vmatpush3.msra.mxu0 %v202_v15  ;;  %2872 = vmatprep.mubr.msk.f32.mxu0 %vm3038_vm0, %v3037_v0 }
  0x3d   :  { %2877 = vmatprep.subr.mxu1 %v3037_v0  ;;  %2886 = vmatprep.subr.mxu0 %v3037_v0 }
  0x3e   :  { %2873 = vmatmul.mubr.f32.vlgmr.msra.gmra.mxu0 %v146_v17  ;;  %2878 = vmatpush3.msra.mxu1 %v3089_v5 }
  0x3f   :  { %2887 = vmatpush3.msra.mxu0 %v182_v16  ;;  %2879 = vmatprep.subr.mxu1 %v3037_v0  ;;  %v565_v16 = vld [vmem:[#allocation7 + $0x8] sm:$0xff] }
  0x40   :  { %2888 = vmatprep.subr.mxu0 %v3037_v0  ;;  %2880 = vmatpush3.msra.mxu1 %v3091_v6  ;;  %v3205_v17 = vand.u32 4294901760, %v565_v16 }
  0x41   :  { %2889 = vmatpush3.msra.mxu0 %v189_v18  ;;  %2881 = vmatprep.subr.mxu1 %v3037_v0  ;;  %v564_v18 = vld [vmem:[#allocation7] sm:$0xff] }
  0x42   :  { %2890 = vmatprep.subr.mxu0 %v3037_v0  ;;  %2882 = vmatpush3.msra.mxu1 %v3093_v9  ;;  %v3214_v21 = vsub.f32 %v565_v16, %v3205_v17 }
  0x43   :  { %2883 = vmatprep.mubr.msk.f32.mxu1 %vm3038_vm0, %v3037_v0  ;;  %2891 = vmatpush3.msra.mxu0 %v196_v19 }
  0x44   :  { %2884 = vmatmul.mubr.f32.vlgmr.msra.gmra.mxu1 %v147_v22  ;;  %2892 = vmatprep.subr.mxu0 %v3037_v0  ;;  %v747_v26 = vand.u32 4294901760, %v3214_v21 }
  0x45   :  { %2897 = vmatprep.subr.mxu1 %v3037_v0  ;;  %2893 = vmatpush3.msra.mxu0 %v203_v20  ;;  %v3210_v20 = vand.u32 4294901760, %v564_v18 }
  0x46   :  { %2894 = vmatprep.mubr.msk.f32.mxu0 %vm3038_vm0, %v3037_v0  ;;  %2898 = vmatpush3.msra.mxu1 %v3087_v4  ;;  %v748_v31 = vsub.f32 %v3214_v21, %v747_v26 }
  0x47   :  { %2895 = vmatmul.mubr.f32.vlgmr.msra.gmra.mxu0 %v3098_v12  ;;  %2899 = vmatprep.subr.mxu1 %v3037_v0  ;;  %v3219_v24 = vsub.f32 %v564_v18, %v3210_v20 }
  0x48   :  { %2905 = vmatprep.mubr.msk.f32.mxu1 %vm3038_vm0, %v3037_v0  ;;  %2900 = vmatpush3.msra.mxu1 %v3089_v5  ;;  %v749_v38 = vand.u32 4294901760, %v748_v31 }
  0x49   :  { %673 = vmatprep.mubr.f32.mxu0 %v3037_v0  ;;  %2901 = vmatprep.subr.mxu1 %v3037_v0  ;;  %v753_v29 = vand.u32 4294901760, %v3219_v24 }
  0x4a   :  { %2902 = vmatpush3.msra.mxu1 %v3091_v6  ;;  %626 = vmatprep.subr.mxu0 %v3150_v35 }
  0x4b   :  { %2903 = vmatprep.subr.mxu1 %v3037_v0  ;;  %628 = vmatpush1.msra.mxu0 %v3152_v36  ;;  %v754_v34 = vsub.f32 %v3219_v24, %v753_v29 }
  0x4c   :  { %2904 = vmatpush3.msra.mxu1 %v3093_v9  ;;  %630 = vmatprep.subr.mxu0 %v3154_v37 }
  0x4d   :  { %2906 = vmatmul.mubr.f32.vlgmr.msra.gmra.mxu1 %v3098_v12  ;;  %632 = vmatpush1.msra.mxu0 %v3156_v40  ;;  %v572_v12 = vld [vmem:[#allocation7 + $0x40] sm:$0xff]  ;;  %v755_v39 = vand.u32 4294901760, %v754_v34 }
  0x4e   :  { %789 = vmatprep.mubr.f32.mxu1 %v3037_v0  ;;  %634 = vmatprep.subr.mxu0 %v3158_v41  ;;  %v3203_v15 = vand.u32 4294901760, %v572_v12 }
  0x4f   :  { %714 = vmatprep.subr.mxu1 %v713_v57 }
  0x50   :  { %720 = vmatpush1.msra.mxu1 %v719_v58  ;;  %v3208_v19 = vsub.f32 %v572_v12, %v3203_v15  ;;  %636 = vmatpush1.msra.mxu0 %v3203_v15  ;;  %v583_v58 = vld [vmem:[#allocation7 + $0x98] sm:$0xff] }
  0x51   :  { %726 = vmatprep.subr.mxu1 %v725_v59  ;;  %638 = vmatprep.subr.mxu0 %v3205_v17  ;;  %v3239_v59 = vand.u32 4294901760, %v591_v54 }
  0x52   :  { %732 = vmatpush1.msra.mxu1 %v731_v60  ;;  %v741_v23 = vand.u32 4294901760, %v3208_v19  ;;  %640 = vmatpush1.msra.mxu0 %v3210_v20  ;;  %v582_v60 = vld [vmem:[#allocation7 + $0x90] sm:$0xff] }
  0x53   :  { %738 = vmatprep.subr.mxu1 %v737_v61  ;;  %823 = vmatprep.subr.mxu0 %v3161_v42 }
  0x54   :  { %v742_v28 = vsub.f32 %v3208_v19, %v741_v23 }
  0x56   :  { %v743_v33 = vand.u32 4294901760, %v742_v28 }
  0x58   :  { %744 = vmatpush1.msra.mxu1 %v743_v33 }
  0x59   :  { %750 = vmatprep.subr.mxu1 %v749_v38 }
  0x5a   :  { %756 = vmatpush1.msra.mxu1 %v755_v39 }
  0x5b   :  { %911 = vmatprep.subr.mxu1 %v3150_v35 }
  0xf5   :  { %v151_v62 = vpop.f32.mrf.mxu0 }
  0xf6   :  { %v152_v5 = vadd.f32 %v2811_v2, %v151_v62  ;;  %v3245_v62 = vand.u32 4294901760, %v590_v56  ;;  %v574_v2 = vld [vmem:[#allocation7 + $0x50] sm:$0xff] }
  0xf7   :  { %v2852_v63 = vpop.f32.mrf.mxu0 }
  0xf8   :  { %v575_v63 = vld [vmem:[#allocation7 + $0x58] sm:$0xff] }
  0xf9   :  { %v242_v1 = vpop.f32.mrf.mxu1 }
  0xfa   :  { %v243_v7 = vadd.f32 %v242_v1, %v152_v5  ;;  %v3249_v1 = vand.u32 4294901760, %v583_v58  ;;  %v567_v5 = vld [vmem:[#allocation7 + $0x18] sm:$0xff] }
  0xfb   :  { %v2863_v3 = vpop.f32.mrf.mxu1 }
  0xfc   :  { %v3273_v12 = vsub.f32 %v583_v58, %v3249_v1 }
  0xfe   :  { %v322_v4 = vpop.f32.mrf.mxu0 }
  0xff   :  { %v323_v10 = vadd.f32 %v322_v4, %v243_v7  ;;  %v3255_v4 = vand.u32 4294901760, %v582_v60  ;;  %v3261_v7 = vand.u32 4294901760, %v575_v63 }
 0x100   :  { %v2874_v6 = vpop.f32.mrf.mxu0 }
 0x101   :  { %v3259_v6 = vsub.f32 %v591_v54, %v3239_v59  ;;  %v3281_v16 = vsub.f32 %v582_v60, %v3255_v4 }
 0x104   :  { %v399_v8 = vpop.f32.mrf.mxu1 }
 0x105   :  { %v400_v13 = vadd.f32 %v399_v8, %v323_v10  ;;  %v566_v8 = vld [vmem:[#allocation7 + $0x10] sm:$0xff]  ;;  %v3267_v10 = vsub.f32 %v590_v56, %v3245_v62 }
 0x106   :  { %v2885_v9 = vpop.f32.mrf.mxu1  ;;  %v3283_v18 = vand.u32 4294901760, %v566_v8 }
 0x107   :  { %v482_v11 = vpop.f32.mrf.mxu0 }
 0x108   :  { %v483_v22 = vadd.f32 %v482_v11, %v400_v13  ;;  %v3269_v11 = vand.u32 4294901760, %v574_v2  ;;  %v3275_v13 = vand.u32 4294901760, %v567_v5 }
 0x109   :  { %v2896_v14 = vpop.f32.mrf.mxu0 }
 0x10a   :  { %v3294_v28 = vsub.f32 %v574_v2, %v3269_v11  ;;  %v3300_v31 = vsub.f32 %v567_v5, %v3275_v13 }
 0x10c   :  { %v1284_v34 = vand.u32 4294901760, %v3294_v28  ;;  %v1290_v38 = vand.u32 4294901760, %v3300_v31 }
 0x10d   :  { %v557_v25 = vpop.f32.mrf.mxu1 }
 0x10e   :  { %v558_v27 = vadd.f32 %v557_v25, %v483_v22  ;;  %v1254_v22 = vand.u32 4294901760, %v3259_v6  ;;  %v3288_v25 = vsub.f32 %v575_v63, %v3261_v7 }
 0x10f   :  { %v2907_v30 = vpop.f32.mrf.mxu1 }
 0x110   :  { %v562_v32 = vmul.f32 1.442695, %v558_v27  ;;  %561 = vst.msk [vmem:[#allocation8] sm:$0xff] %vm72_vm1, %v558_v27  ;;  %v1260_v27 = vand.u32 4294901760, %v3267_v10  ;;  %v1266_v30 = vand.u32 4294901760, %v3273_v12  ;;  %v1278_v33 = vand.u32 4294901760, %v3288_v25 }
 0x112   :  { %2920 = vpow2.f32 %v562_v32  ;;  %v3306_v32 = vsub.f32 %v566_v8, %v3283_v18 }
 0x114   :  { %v1296_v39 = vand.u32 4294901760, %v3306_v32 }
 0x116   :  { %v1297_v56 = vsub.f32 %v3306_v32, %v1296_v39 }
 0x11f   :  { %v2921_v52 = vpop.eup %2920 }
 0x120   :  { %597 = vrot.lane.b32.xlu0 %v2921_v52, %s3039_s2  ;;  %v1279_v52 = vsub.f32 %v3288_v25, %v1278_v33 }
 0x122   :  { %v1280_v58 = vand.u32 4294901760, %v1279_v52 }
 0x192   :  { %v598_v53 = vpop.permute.xlu0 %597 }
 0x193   :  { %v599_v55 = vsel %vm72_vm1, %v598_v53, 0  ;;  %v1285_v53 = vsub.f32 %v3294_v28, %v1284_v34 }
 0x194   :  { %v3237_v57 = vand.u32 4294901760, %v599_v55 }
 0x195   :  { %v1286_v60 = vand.u32 4294901760, %v1285_v53 }
 0x196   :  { %v3242_v61 = vsub.f32 %v599_v55, %v3237_v57  ;;  %791 = vmatmul.mubr.f32.vlgmr.msra.gmra.mxu1 %v3237_v57  ;;  %v1291_v55 = vsub.f32 %v3300_v31, %v1290_v38 }
 0x197   :  { %913 = vmatpush1.msra.mxu1 %v3152_v36  ;;  %958 = vmatprep.mubr.f32.mxu1 %v3037_v0 }
 0x198   :  { %915 = vmatprep.subr.mxu1 %v3154_v37  ;;  %v3253_v3 = vand.u32 4294901760, %v3242_v61  ;;  %v1292_v42 = vand.u32 4294901760, %v1291_v55 }
 0x199   :  { %917 = vmatpush1.msra.mxu1 %v3156_v40 }
 0x19a   :  { %919 = vmatprep.subr.mxu1 %v3158_v41  ;;  %v677_v9 = vsub.f32 %v3242_v61, %v3253_v3 }
 0x19b   :  { %921 = vmatpush1.msra.mxu1 %v3203_v15 }
 0x19c   :  { %923 = vmatprep.subr.mxu1 %v3205_v17  ;;  %v3278_v14 = vand.u32 4294901760, %v677_v9 }
 0x19d   :  { %925 = vmatpush1.msra.mxu1 %v3210_v20 }
 0x19e   :  { %962 = vmatmul.mubr.f32.vlgmr.msra.gmra.mxu1 %v3253_v3  ;;  %1089 = vmatprep.subr.mxu1 %v3150_v35  ;;  %v1272_v35 = vand.u32 4294901760, %v3281_v16 }
 0x19f   :  { %679 = vmatmul.mubr.f32.vlgmr.msra.gmra.mxu0 %v3278_v14  ;;  %1091 = vmatpush1.msra.mxu1 %v3152_v36  ;;  %v1255_v36 = vsub.f32 %v3259_v6, %v1254_v22 }
 0x1a0   :  { %826 = vmatpush1.msra.mxu0 %v3164_v43  ;;  %1093 = vmatprep.subr.mxu1 %v3154_v37  ;;  %v1261_v37 = vsub.f32 %v3267_v10, %v1260_v27  ;;  %v593_v43 = vld [vmem:[#allocation7 + $0xe8] sm:$0xff] }
 0x1a1   :  { %829 = vmatprep.subr.mxu0 %v3167_v44  ;;  %1095 = vmatpush1.msra.mxu1 %v3156_v40  ;;  %v1267_v40 = vsub.f32 %v3273_v12, %v1266_v30  ;;  %v592_v44 = vld [vmem:[#allocation7 + $0xe0] sm:$0xff] }
 0x1a2   :  { %832 = vmatpush1.msra.mxu0 %v3171_v45  ;;  %1097 = vmatprep.subr.mxu1 %v3158_v41  ;;  %v1273_v41 = vsub.f32 %v3281_v16, %v1272_v35  ;;  %v585_v45 = vld [vmem:[#allocation7 + $0xa8] sm:$0xff] }
 0x1a3   :  { %835 = vmatprep.subr.mxu0 %v3174_v46  ;;  %1099 = vmatpush1.msra.mxu1 %v3203_v15  ;;  %v1256_v15 = vand.u32 4294901760, %v1255_v36  ;;  %v1268_v54 = vand.u32 4294901760, %v1267_v40  ;;  %v3374_v46 = vand.u32 4294901760, %v593_v43 }
 0x1a4   :  { %838 = vmatpush1.msra.mxu0 %v3208_v19  ;;  %1101 = vmatprep.subr.mxu1 %v3205_v17  ;;  %v1262_v17 = vand.u32 4294901760, %v1261_v37  ;;  %v576_v19 = vld [vmem:[#allocation7 + $0x60] sm:$0xff] }
 0x1a5   :  { %841 = vmatprep.subr.mxu0 %v3214_v21  ;;  %877 = vmatprep.mubr.f32.mxu0 %v3037_v0  ;;  %v3400_v2 = vand.u32 4294901760, %v576_v19 }
 0x1a6   :  { %844 = vmatpush1.msra.mxu0 %v3219_v24  ;;  %1103 = vmatpush1.msra.mxu1 %v3210_v20  ;;  %v1274_v20 = vand.u32 4294901760, %v1273_v41  ;;  %v3391_v24 = vsub.f32 %v593_v43, %v3374_v46 }
 0x1a7   :  { %1136 = vmatprep.mubr.f32.mxu1 %v3037_v0  ;;  %880 = vmatmul.mubr.f32.vlgmr.msra.gmra.mxu0 %v3242_v61 }
 0x1a8   :  { %995 = vmatprep.subr.mxu0 %v711_v47  ;;  %1138 = vmatmul.mubr.f32.vlgmr.msra.gmra.mxu1 %v3237_v57  ;;  %v1298_v47 = vand.u32 4294901760, %v1297_v56  ;;  %v1797_v37 = vand.u32 4294901760, %v3391_v24 }
 0x1a9   :  { %1257 = vmatprep.subr.mxu1 %v1256_v15  ;;  %999 = vmatpush1.msra.mxu0 %v717_v48  ;;  %v584_v48 = vld [vmem:[#allocation7 + $0xa0] sm:$0xff]  ;;  %v3426_v15 = vsub.f32 %v576_v19, %v3400_v2 }
 0x1aa   :  { %1263 = vmatpush1.msra.mxu1 %v1262_v17  ;;  %1003 = vmatprep.subr.mxu0 %v723_v49  ;;  %v3378_v49 = vand.u32 4294901760, %v592_v44  ;;  %v3386_v21 = vand.u32 4294901760, %v584_v48 }
 0x1ab   :  { %1269 = vmatprep.subr.mxu1 %v1268_v54  ;;  %1007 = vmatpush1.msra.mxu0 %v729_v50  ;;  %v577_v50 = vld [vmem:[#allocation7 + $0x68] sm:$0xff] }
 0x1ac   :  { %1275 = vmatpush1.msra.mxu1 %v1274_v20  ;;  %1011 = vmatprep.subr.mxu0 %v735_v51  ;;  %v3382_v51 = vand.u32 4294901760, %v585_v45  ;;  %v3398_v63 = vsub.f32 %v592_v44, %v3378_v49  ;;  %v3412_v9 = vsub.f32 %v584_v48, %v3386_v21  ;;  %v1827_v20 = vand.u32 4294901760, %v3426_v15 }
 0x1ad   :  { %1281 = vmatprep.subr.mxu1 %v1280_v58  ;;  %1015 = vmatpush1.msra.mxu0 %v741_v23  ;;  %v569_v23 = vld [vmem:[#allocation7 + $0x28] sm:$0xff] }
 0x1ae   :  { %1287 = vmatpush1.msra.mxu1 %v1286_v60  ;;  %1019 = vmatprep.subr.mxu0 %v747_v26  ;;  %v3393_v26 = vand.u32 4294901760, %v577_v50  ;;  %v3405_v5 = vsub.f32 %v585_v45, %v3382_v51  ;;  %v3407_v8 = vand.u32 4294901760, %v569_v23  ;;  %v1803_v41 = vand.u32 4294901760, %v3398_v63 }
 0x1af   :  { %1293 = vmatprep.subr.mxu1 %v1292_v42  ;;  %1023 = vmatpush1.msra.mxu0 %v753_v29  ;;  %v568_v29 = vld [vmem:[#allocation7 + $0x20] sm:$0xff]  ;;  %v1815_v53 = vand.u32 4294901760, %v3412_v9  ;;  %v1828_v42 = vsub.f32 %v3426_v15, %v1827_v20 }
 0x1b0   :  { %1056 = vmatprep.mubr.f32.mxu0 %v3037_v0  ;;  %1299 = vmatpush1.msra.mxu1 %v1298_v47  ;;  %v3414_v36 = vand.u32 4294901760, %v568_v29  ;;  %v3420_v40 = vsub.f32 %v577_v50, %v3393_v26  ;;  %v1809_v52 = vand.u32 4294901760, %v3405_v5  ;;  %v3432_v17 = vsub.f32 %v569_v23, %v3407_v8 }
 0x1b1   :  { %1332 = vmatprep.mubr.f32.mxu1 %v3037_v0  ;;  %1058 = vmatmul.mubr.f32.vlgmr.msra.gmra.mxu0 %v3237_v57  ;;  %v1829_v45 = vand.u32 4294901760, %v1828_v42 }
 0x1b2   :  { %1169 = vmatprep.subr.mxu0 %v3239_v59  ;;  %1334 = vmatmul.mubr.f32.vlgmr.msra.gmra.mxu1 %v3237_v57  ;;  %v3438_v54 = vsub.f32 %v568_v29, %v3414_v36  ;;  %v1821_v55 = vand.u32 4294901760, %v3420_v40  ;;  %v1833_v56 = vand.u32 4294901760, %v3432_v17 }
 0x1b3   :  { %1454 = vmatprep.subr.mxu1 %v3239_v59  ;;  %1171 = vmatpush1.msra.mxu0 %v3245_v62 }
 0x1b4   :  { %1456 = vmatpush1.msra.mxu1 %v3245_v62  ;;  %1173 = vmatprep.subr.mxu0 %v3249_v1  ;;  %v1839_v58 = vand.u32 4294901760, %v3438_v54  ;;  %v1822_v60 = vsub.f32 %v3420_v40, %v1821_v55  ;;  %v1834_v47 = vsub.f32 %v3432_v17, %v1833_v56 }
 0x1b5   :  { %1458 = vmatprep.subr.mxu1 %v3249_v1  ;;  %1175 = vmatpush1.msra.mxu0 %v3255_v4 }
 0x1b6   :  { %1460 = vmatpush1.msra.mxu1 %v3255_v4  ;;  %1177 = vmatprep.subr.mxu0 %v3261_v7  ;;  %v1840_v43 = vsub.f32 %v3438_v54, %v1839_v58  ;;  %v1823_v44 = vand.u32 4294901760, %v1822_v60 }
 0x1b7   :  { %1462 = vmatprep.subr.mxu1 %v3261_v7  ;;  %1179 = vmatpush1.msra.mxu0 %v3269_v11 }
 0x1b8   :  { %1464 = vmatpush1.msra.mxu1 %v3269_v11  ;;  %1181 = vmatprep.subr.mxu0 %v3275_v13 }
 0x1b9   :  { %1466 = vmatprep.subr.mxu1 %v3275_v13  ;;  %1183 = vmatpush1.msra.mxu0 %v3283_v18 }
 0x1ba   :  { %1216 = vmatprep.mubr.f32.mxu0 %v3037_v0  ;;  %1468 = vmatpush1.msra.mxu1 %v3283_v18 }
 0x1bb   :  { %1501 = vmatprep.mubr.f32.mxu1 %v3037_v0  ;;  %1222 = vmatmul.mubr.f32.vlgmr.msra.gmra.mxu0 %v3278_v14 }
 0x1bc   :  { %1366 = vmatprep.subr.mxu0 %v3259_v6  ;;  %1505 = vmatmul.mubr.f32.vlgmr.msra.gmra.mxu1 %v3253_v3  ;;  %v1835_v6 = vand.u32 4294901760, %v1834_v47 }
 0x1bd   :  { %1632 = vmatprep.subr.mxu1 %v3239_v59  ;;  %1369 = vmatpush1.msra.mxu0 %v3267_v10  ;;  %v1798_v59 = vsub.f32 %v3391_v24, %v1797_v37  ;;  %v595_v10 = vld [vmem:[#allocation7 + $0xf8] sm:$0xff] }
 0x1be   :  { %1634 = vmatpush1.msra.mxu1 %v3245_v62  ;;  %1372 = vmatprep.subr.mxu0 %v3273_v12  ;;  %v1804_v62 = vsub.f32 %v3398_v63, %v1803_v41  ;;  %v594_v12 = vld [vmem:[#allocation7 + $0xf0] sm:$0xff] }
 0x1bf   :  { %1636 = vmatprep.subr.mxu1 %v3249_v1  ;;  %1375 = vmatpush1.msra.mxu0 %v3281_v16  ;;  %v1810_v1 = vsub.f32 %v3405_v5, %v1809_v52  ;;  %v587_v16 = vld [vmem:[#allocation7 + $0xb8] sm:$0xff] }
 0x1c0   :  { %1638 = vmatpush1.msra.mxu1 %v3255_v4  ;;  %1378 = vmatprep.subr.mxu0 %v3288_v25  ;;  %v1816_v4 = vsub.f32 %v3412_v9, %v1815_v53  ;;  %v3506_v25 = vand.u32 4294901760, %v595_v10 }
 0x1c1   :  { %1640 = vmatprep.subr.mxu1 %v3261_v7  ;;  %1381 = vmatpush1.msra.mxu0 %v3294_v28  ;;  %v1799_v7 = vand.u32 4294901760, %v1798_v59  ;;  %v3510_v28 = vand.u32 4294901760, %v594_v12 }
 0x1c2   :  { %1642 = vmatpush1.msra.mxu1 %v3269_v11  ;;  %1384 = vmatprep.subr.mxu0 %v3300_v31  ;;  %v1805_v11 = vand.u32 4294901760, %v1804_v62  ;;  %v3514_v31 = vand.u32 4294901760, %v587_v16 }
 0x1c3   :  { %1644 = vmatprep.subr.mxu1 %v3275_v13  ;;  %1387 = vmatpush1.msra.mxu0 %v3306_v32  ;;  %v1811_v13 = vand.u32 4294901760, %v1810_v1  ;;  %v3530_v48 = vsub.f32 %v594_v12, %v3510_v28 }
 0x1c4   :  { %1420 = vmatprep.mubr.f32.mxu0 %v3037_v0  ;;  %1646 = vmatpush1.msra.mxu1 %v3283_v18  ;;  %v1817_v18 = vand.u32 4294901760, %v1816_v4  ;;  %v3537_v19 = vsub.f32 %v587_v16, %v3514_v31 }
 0x1c5   :  { %1679 = vmatprep.mubr.f32.mxu1 %v3037_v0  ;;  %1423 = vmatmul.mubr.f32.vlgmr.msra.gmra.mxu0 %v3242_v61  ;;  %v2346_v4 = vand.u32 4294901760, %v3530_v48 }
 0x1c6   :  { %1538 = vmatprep.subr.mxu0 %v1254_v22  ;;  %1681 = vmatmul.mubr.f32.vlgmr.msra.gmra.mxu1 %v3237_v57  ;;  %v1841_v22 = vand.u32 4294901760, %v1840_v43  ;;  %v2352_v60 = vand.u32 4294901760, %v3537_v19 }
 0x1c7   :  { %1800 = vmatprep.subr.mxu1 %v1799_v7  ;;  %1542 = vmatpush1.msra.mxu0 %v1260_v27  ;;  %v586_v27 = vld [vmem:[#allocation7 + $0xb0] sm:$0xff] }
 0x1c8   :  { %1806 = vmatpush1.msra.mxu1 %v1805_v11  ;;  %1546 = vmatprep.subr.mxu0 %v1266_v30  ;;  %v579_v30 = vld [vmem:[#allocation7 + $0x78] sm:$0xff]  ;;  %v3518_v32 = vand.u32 4294901760, %v586_v27 }
 0x1c9   :  { %1812 = vmatprep.subr.mxu1 %v1811_v13  ;;  %1550 = vmatpush1.msra.mxu0 %v1272_v35  ;;  %v578_v35 = vld [vmem:[#allocation7 + $0x70] sm:$0xff] }
 0x1ca   :  { %1818 = vmatpush1.msra.mxu1 %v1817_v18  ;;  %1554 = vmatprep.subr.mxu0 %v1278_v33  ;;  %v571_v33 = vld [vmem:[#allocation7 + $0x38] sm:$0xff]  ;;  %v3532_v50 = vand.u32 4294901760, %v578_v35  ;;  %v3544_v29 = vsub.f32 %v586_v27, %v3518_v32 }
 0x1cb   :  { %1824 = vmatprep.subr.mxu1 %v1823_v44  ;;  %1558 = vmatpush1.msra.mxu0 %v1284_v34  ;;  %v3523_v34 = vsub.f32 %v595_v10, %v3506_v25  ;;  %v3539_v23 = vand.u32 4294901760, %v571_v33 }
 0x1cc   :  { %1830 = vmatpush1.msra.mxu1 %v1829_v45  ;;  %1562 = vmatprep.subr.mxu0 %v1290_v38  ;;  %v3525_v38 = vand.u32 4294901760, %v579_v30  ;;  %v3558_v7 = vsub.f32 %v578_v35, %v3532_v50  ;;  %v2358_v42 = vand.u32 4294901760, %v3544_v29 }
 0x1cd   :  { %1836 = vmatprep.subr.mxu1 %v1835_v6  ;;  %1566 = vmatpush1.msra.mxu0 %v1296_v39  ;;  %v570_v39 = vld [vmem:[#allocation7 + $0x30] sm:$0xff]  ;;  %v2340_v62 = vand.u32 4294901760, %v3523_v34  ;;  %v3564_v11 = vsub.f32 %v571_v33, %v3539_v23 }
 0x1ce   :  { %1599 = vmatprep.mubr.f32.mxu0 %v3037_v0  ;;  %1842 = vmatpush1.msra.mxu1 %v1841_v22  ;;  %v3546_v59 = vand.u32 4294901760, %v570_v39  ;;  %v3552_v1 = vsub.f32 %v579_v30, %v3525_v38  ;;  %v2370_v18 = vand.u32 4294901760, %v3558_v7 }
 0x1cf   :  { %1875 = vmatprep.mubr.f32.mxu1 %v3037_v0  ;;  %1601 = vmatmul.mubr.f32.vlgmr.msra.gmra.mxu0 %v3237_v57  ;;  %v2376_v43 = vand.u32 4294901760, %v3564_v11 }
 0x1d0   :  { %1712 = vmatprep.subr.mxu0 %v3374_v46  ;;  %1877 = vmatmul.mubr.f32.vlgmr.msra.gmra.mxu1 %v3237_v57  ;;  %v3570_v13 = vsub.f32 %v570_v39, %v3546_v59  ;;  %v2364_v47 = vand.u32 4294901760, %v3552_v1  ;;  %v2371_v6 = vsub.f32 %v3558_v7, %v2370_v18 }
 0x1d1   :  { %1997 = vmatprep.subr.mxu1 %v3374_v46  ;;  %1714 = vmatpush1.msra.mxu0 %v3378_v49  ;;  %v2377_v22 = vsub.f32 %v3564_v11, %v2376_v43 }
 0x1d2   :  { %1999 = vmatpush1.msra.mxu1 %v3378_v49  ;;  %1716 = vmatprep.subr.mxu0 %v3382_v51  ;;  %v2382_v44 = vand.u32 4294901760, %v3570_v13  ;;  %v2365_v45 = vsub.f32 %v3552_v1, %v2364_v47  ;;  %v2372_v16 = vand.u32 4294901760, %v2371_v6 }
 0x1d3   :  { %2001 = vmatprep.subr.mxu1 %v3382_v51  ;;  %1718 = vmatpush1.msra.mxu0 %v3386_v21 }
 0x1d4   :  { %2003 = vmatpush1.msra.mxu1 %v3386_v21  ;;  %1720 = vmatprep.subr.mxu0 %v3393_v26  ;;  %v2383_v10 = vsub.f32 %v3570_v13, %v2382_v44  ;;  %v2366_v12 = vand.u32 4294901760, %v2365_v45 }
 0x1d5   :  { %2005 = vmatprep.subr.mxu1 %v3393_v26  ;;  %1722 = vmatpush1.msra.mxu0 %v3400_v2 }
 0x1d6   :  { %2007 = vmatpush1.msra.mxu1 %v3400_v2  ;;  %1724 = vmatprep.subr.mxu0 %v3407_v8 }
 0x1d7   :  { %2009 = vmatprep.subr.mxu1 %v3407_v8  ;;  %1726 = vmatpush1.msra.mxu0 %v3414_v36 }
 0x1d8   :  { %1759 = vmatprep.mubr.f32.mxu0 %v3037_v0  ;;  %2011 = vmatpush1.msra.mxu1 %v3414_v36 }
 0x1d9   :  { %2044 = vmatprep.mubr.f32.mxu1 %v3037_v0  ;;  %1765 = vmatmul.mubr.f32.vlgmr.msra.gmra.mxu0 %v3278_v14 }
 0x1da   :  { %1909 = vmatprep.subr.mxu0 %v3391_v24  ;;  %2048 = vmatmul.mubr.f32.vlgmr.msra.gmra.mxu1 %v3253_v3  ;;  %v2378_v24 = vand.u32 4294901760, %v2377_v22 }
 0x1db   :  { %2175 = vmatprep.subr.mxu1 %v3374_v46  ;;  %1912 = vmatpush1.msra.mxu0 %v3398_v63  ;;  %v2341_v46 = vsub.f32 %v3523_v34, %v2340_v62 }
 0x1dc   :  { %2177 = vmatpush1.msra.mxu1 %v3378_v49  ;;  %1915 = vmatprep.subr.mxu0 %v3405_v5  ;;  %v2347_v49 = vsub.f32 %v3530_v48, %v2346_v4 }
 0x1dd   :  { %2179 = vmatprep.subr.mxu1 %v3382_v51  ;;  %1918 = vmatpush1.msra.mxu0 %v3412_v9  ;;  %v2353_v51 = vsub.f32 %v3537_v19, %v2352_v60 }
 0x1de   :  { %2181 = vmatpush1.msra.mxu1 %v3386_v21  ;;  %1921 = vmatprep.subr.mxu0 %v3420_v40  ;;  %v2359_v21 = vsub.f32 %v3544_v29, %v2358_v42 }
 0x1df   :  { %2183 = vmatprep.subr.mxu1 %v3393_v26  ;;  %1924 = vmatpush1.msra.mxu0 %v3426_v15  ;;  %v2342_v26 = vand.u32 4294901760, %v2341_v46 }
 0x1e0   :  { %2185 = vmatpush1.msra.mxu1 %v3400_v2  ;;  %1927 = vmatprep.subr.mxu0 %v3432_v17  ;;  %v2348_v2 = vand.u32 4294901760, %v2347_v49 }
 0x1e1   :  { %2187 = vmatprep.subr.mxu1 %v3407_v8  ;;  %1930 = vmatpush1.msra.mxu0 %v3438_v54  ;;  %v2354_v8 = vand.u32 4294901760, %v2353_v51 }
 0x1e2   :  { %1963 = vmatprep.mubr.f32.mxu0 %v3037_v0  ;;  %2189 = vmatpush1.msra.mxu1 %v3414_v36  ;;  %v2360_v36 = vand.u32 4294901760, %v2359_v21 }
 0x1e3   :  { %2222 = vmatprep.mubr.f32.mxu1 %v3037_v0  ;;  %1966 = vmatmul.mubr.f32.vlgmr.msra.gmra.mxu0 %v3242_v61 }
 0x1e4   :  { %2081 = vmatprep.subr.mxu0 %v1797_v37  ;;  %2224 = vmatmul.mubr.f32.vlgmr.msra.gmra.mxu1 %v3237_v57  ;;  %v2384_v37 = vand.u32 4294901760, %v2383_v10 }
 0x1e5   :  { %2343 = vmatprep.subr.mxu1 %v2342_v26  ;;  %2085 = vmatpush1.msra.mxu0 %v1803_v41 }
 0x1e6   :  { %2349 = vmatpush1.msra.mxu1 %v2348_v2  ;;  %2089 = vmatprep.subr.mxu0 %v1809_v52 }
 0x1e7   :  { %2355 = vmatprep.subr.mxu1 %v2354_v8  ;;  %2093 = vmatpush1.msra.mxu0 %v1815_v53 }
 0x1e8   :  { %2361 = vmatpush1.msra.mxu1 %v2360_v36  ;;  %2097 = vmatprep.subr.mxu0 %v1821_v55 }
 0x1e9   :  { %2367 = vmatprep.subr.mxu1 %v2366_v12  ;;  %2101 = vmatpush1.msra.mxu0 %v1827_v20 }
 0x1ea   :  { %2373 = vmatpush1.msra.mxu1 %v2372_v16  ;;  %2105 = vmatprep.subr.mxu0 %v1833_v56 }
 0x1eb   :  { %2379 = vmatprep.subr.mxu1 %v2378_v24  ;;  %2109 = vmatpush1.msra.mxu0 %v1839_v58 }
 0x1ec   :  { %2142 = vmatprep.mubr.f32.mxu0 %v3037_v0  ;;  %2385 = vmatpush1.msra.mxu1 %v2384_v37 }
 0x1ed   :  { %2418 = vmatprep.mubr.f32.mxu1 %v3037_v0  ;;  %2144 = vmatmul.mubr.f32.vlgmr.msra.gmra.mxu0 %v3237_v57 }
 0x1ee   :  { %2255 = vmatprep.subr.mxu0 %v3506_v25  ;;  %2420 = vmatmul.mubr.f32.vlgmr.msra.gmra.mxu1 %v3237_v57 }
 0x1ef   :  { %2540 = vmatprep.subr.mxu1 %v3506_v25  ;;  %2257 = vmatpush1.msra.mxu0 %v3510_v28 }
 0x1f0   :  { %2542 = vmatpush1.msra.mxu1 %v3510_v28  ;;  %2259 = vmatprep.subr.mxu0 %v3514_v31 }
 0x1f1   :  { %2544 = vmatprep.subr.mxu1 %v3514_v31  ;;  %2261 = vmatpush1.msra.mxu0 %v3518_v32 }
 0x1f2   :  { %2546 = vmatpush1.msra.mxu1 %v3518_v32  ;;  %2263 = vmatprep.subr.mxu0 %v3525_v38 }
 0x1f3   :  { %2548 = vmatprep.subr.mxu1 %v3525_v38  ;;  %2265 = vmatpush1.msra.mxu0 %v3532_v50 }
 0x1f4   :  { %2550 = vmatpush1.msra.mxu1 %v3532_v50  ;;  %2267 = vmatprep.subr.mxu0 %v3539_v23 }
 0x1f5   :  { %2552 = vmatprep.subr.mxu1 %v3539_v23  ;;  %2269 = vmatpush1.msra.mxu0 %v3546_v59 }
 0x1f6   :  { %2302 = vmatprep.mubr.f32.mxu0 %v3037_v0  ;;  %2554 = vmatpush1.msra.mxu1 %v3546_v59 }
 0x1f7   :  { %2587 = vmatprep.mubr.f32.mxu1 %v3037_v0  ;;  %2308 = vmatmul.mubr.f32.vlgmr.msra.gmra.mxu0 %v3278_v14 }
 0x1f8   :  { %2452 = vmatprep.subr.mxu0 %v3523_v34  ;;  %2591 = vmatmul.mubr.f32.vlgmr.msra.gmra.mxu1 %v3253_v3 }
 0x1f9   :  { %2718 = vmatprep.subr.mxu1 %v3506_v25  ;;  %2455 = vmatpush1.msra.mxu0 %v3530_v48 }
 0x1fa   :  { %2720 = vmatpush1.msra.mxu1 %v3510_v28  ;;  %2458 = vmatprep.subr.mxu0 %v3537_v19 }
 0x1fb   :  { %2722 = vmatprep.subr.mxu1 %v3514_v31  ;;  %2461 = vmatpush1.msra.mxu0 %v3544_v29 }
 0x1fc   :  { %2724 = vmatpush1.msra.mxu1 %v3518_v32  ;;  %2464 = vmatprep.subr.mxu0 %v3552_v1 }
 0x1fd   :  { %2726 = vmatprep.subr.mxu1 %v3525_v38  ;;  %2467 = vmatpush1.msra.mxu0 %v3558_v7 }
 0x1fe   :  { %2728 = vmatpush1.msra.mxu1 %v3532_v50  ;;  %2470 = vmatprep.subr.mxu0 %v3564_v11 }
 0x1ff   :  { %2730 = vmatprep.subr.mxu1 %v3539_v23  ;;  %2473 = vmatpush1.msra.mxu0 %v3570_v13 }
 0x200   :  { %2506 = vmatprep.mubr.f32.mxu0 %v3037_v0  ;;  %2732 = vmatpush1.msra.mxu1 %v3546_v59 }
 0x201   :  { %2765 = vmatprep.mubr.f32.mxu1 %v3037_v0  ;;  %2509 = vmatmul.mubr.f32.vlgmr.msra.gmra.mxu0 %v3242_v61 }
 0x202   :  { %2624 = vmatprep.subr.mxu0 %v2340_v62  ;;  %2767 = vmatmul.mubr.f32.vlgmr.msra.gmra.mxu1 %v3237_v57 }
 0x203   :  { %2628 = vmatpush1.msra.mxu0 %v2346_v4  ;;  %2685 = vmatprep.mubr.f32.mxu0 %v3037_v0 }
 0x204   :  { %2632 = vmatprep.subr.mxu0 %v2352_v60 }
 0x205   :  { %2636 = vmatpush1.msra.mxu0 %v2358_v42 }
 0x206   :  { %2640 = vmatprep.subr.mxu0 %v2364_v47 }
 0x207   :  { %2644 = vmatpush1.msra.mxu0 %v2370_v18 }
 0x208   :  { %2648 = vmatprep.subr.mxu0 %v2376_v43 }
 0x209   :  { %2652 = vmatpush1.msra.mxu0 %v2382_v44 }
 0x20a   :  { %2687 = vmatmul.mubr.f32.vlgmr.msra.gmra.mxu0 %v3237_v57 }
 0x20b   :  { %2993 = shalt.err (!%p2990_p5)
}
 0x20c   :  { %2790 = dma.vmem_to_hbm [thread:$0]  %s2788_s12, 128, %s3703_s4, [#allocation4]  }
 0x20d   :  { %s3041_s4 = smov [#allocation9]  }
 0x20e   :  { %s2797_s16 = sshll.u32 %s3041_s4, 4  ;;  %s2798_s16 = int_to_ptr.vmem [resolvable:$true] %s2797_s16 }
 0x20f   :  { %s3002_s17 = scalar_lea.vmem %s2798_s16, 1024  ;;  %p3007_p7 = scmp.lt.s32.totalorder %s2798_s16, %s2798_s16 }
 0x210   :  { %p3003_p6 = scmp.ne.s32.totalorder %s2798_s16, %s3002_s17  ;;  %p3008_p8 = scmp.lt.s32.totalorder %s3002_s17, %s3002_s17 }
 0x212   :  { %p3009_p9 = por %p3008_p8, %p3007_p7 }
 0x214   :  { %p3010_p10 = pnand %p3009_p9, %p3003_p6 }
 0x256   :  { %v792_v61 = vpop.f32.mrf.mxu1 }
 0x258   :  { %v794_v63 = vpop.f32.mrf.mxu1 }
 0x25e   :  { %v963_v5 = vpop.f32.mrf.mxu1 }
 0x25f   :  { %v680_v0 = vpop.f32.mrf.mxu0 }
 0x260   :  { %v793_v57 = vadd.f32 %v792_v61, %v680_v0  ;;  %v965_v52 = vpop.f32.mrf.mxu1 }
 0x261   :  { %v682_v3 = vpop.f32.mrf.mxu0 }
 0x262   :  { %v795_v40 = vadd.f32 %v794_v63, %v682_v3 }
 0x267   :  { %v881_v14 = vpop.f32.mrf.mxu0 }
 0x268   :  { %v882_v41 = vadd.f32 %v881_v14, %v793_v57  ;;  %v1139_v53 = vpop.f32.mrf.mxu1 }
 0x269   :  { %v883_v9 = vpop.f32.mrf.mxu0 }
 0x26a   :  { %v884_v15 = vadd.f32 %v883_v9, %v795_v40  ;;  %v964_v17 = vadd.f32 %v963_v5, %v882_v41  ;;  %v1141_v27 = vpop.f32.mrf.mxu1 }
 0x26c   :  { %v966_v20 = vadd.f32 %v965_v52, %v884_v15 }
 0x271   :  { %v1059_v54 = vpop.f32.mrf.mxu0 }
 0x272   :  { %v1060_v55 = vadd.f32 %v1059_v54, %v964_v17  ;;  %v1335_v31 = vpop.f32.mrf.mxu1 }
 0x273   :  { %v1061_v56 = vpop.f32.mrf.mxu0 }
 0x274   :  { %v1140_v58 = vadd.f32 %v1139_v53, %v1060_v55  ;;  %v1062_v25 = vadd.f32 %v1061_v56, %v966_v20  ;;  %v1337_v33 = vpop.f32.mrf.mxu1 }
 0x276   :  { %2773 = vst [vmem:[#allocation9] sm:$0xff] %v1140_v58  ;;  %v1142_v28 = vadd.f32 %v1141_v27, %v1062_v25 }
 0x278   :  { %2774 = vst [vmem:[#allocation9 + $0x8] sm:$0xff] %v1142_v28 }
 0x27b   :  { %v1223_v30 = vpop.f32.mrf.mxu0 }
 0x27c   :  { %v1336_v34 = vadd.f32 %v1335_v31, %v1223_v30  ;;  %v1506_v38 = vpop.f32.mrf.mxu1 }
 0x27d   :  { %v1225_v35 = vpop.f32.mrf.mxu0 }
 0x27e   :  { %v1338_v48 = vadd.f32 %v1337_v33, %v1225_v35  ;;  %v1508_v23 = vpop.f32.mrf.mxu1 }
 0x285   :  { %v1424_v32 = vpop.f32.mrf.mxu0 }
 0x286   :  { %v1425_v50 = vadd.f32 %v1424_v32, %v1336_v34  ;;  %v1682_v59 = vpop.f32.mrf.mxu1 }
 0x287   :  { %v1426_v39 = vpop.f32.mrf.mxu0 }
 0x288   :  { %v1427_v19 = vadd.f32 %v1426_v39, %v1338_v48  ;;  %v1507_v29 = vadd.f32 %v1506_v38, %v1425_v50  ;;  %v1684_v42 = vpop.f32.mrf.mxu1 }
 0x28a   :  { %v1509_v4 = vadd.f32 %v1508_v23, %v1427_v19 }
 0x28f   :  { %v1602_v62 = vpop.f32.mrf.mxu0 }
 0x290   :  { %v1603_v1 = vadd.f32 %v1602_v62, %v1507_v29  ;;  %v1878_v47 = vpop.f32.mrf.mxu1 }
 0x291   :  { %v1604_v7 = vpop.f32.mrf.mxu0 }
 0x292   :  { %v1683_v60 = vadd.f32 %v1682_v59, %v1603_v1  ;;  %v1605_v11 = vadd.f32 %v1604_v7, %v1509_v4  ;;  %v1880_v51 = vpop.f32.mrf.mxu1 }
 0x294   :  { %2775 = vst [vmem:[#allocation9 + $0x10] sm:$0xff] %v1683_v60  ;;  %v1685_v13 = vadd.f32 %v1684_v42, %v1605_v11 }
 0x296   :  { %2776 = vst [vmem:[#allocation9 + $0x18] sm:$0xff] %v1685_v13 }
 0x299   :  { %v1766_v46 = vpop.f32.mrf.mxu0 }
 0x29a   :  { %v1879_v43 = vadd.f32 %v1878_v47, %v1766_v46  ;;  %v2049_v21 = vpop.f32.mrf.mxu1 }
 0x29b   :  { %v1768_v49 = vpop.f32.mrf.mxu0 }
 0x29c   :  { %v1881_v26 = vadd.f32 %v1880_v51, %v1768_v49  ;;  %v2051_v6 = vpop.f32.mrf.mxu1 }
 0x2a3   :  { %v1967_v18 = vpop.f32.mrf.mxu0 }
 0x2a4   :  { %v1968_v45 = vadd.f32 %v1967_v18, %v1879_v43  ;;  %v2225_v22 = vpop.f32.mrf.mxu1 }
 0x2a5   :  { %v1969_v44 = vpop.f32.mrf.mxu0 }
 0x2a6   :  { %v1970_v2 = vadd.f32 %v1969_v44, %v1881_v26  ;;  %v2050_v8 = vadd.f32 %v2049_v21, %v1968_v45  ;;  %v2227_v0 = vpop.f32.mrf.mxu1 }
 0x2a8   :  { %v2052_v12 = vadd.f32 %v2051_v6, %v1970_v2 }
 0x2ad   :  { %v2145_v36 = vpop.f32.mrf.mxu0 }
 0x2ae   :  { %v2146_v10 = vadd.f32 %v2145_v36, %v2050_v8  ;;  %v2421_v14 = vpop.f32.mrf.mxu1 }
 0x2af   :  { %v2147_v16 = vpop.f32.mrf.mxu0 }
 0x2b0   :  { %v2226_v24 = vadd.f32 %v2225_v22, %v2146_v10  ;;  %v2148_v37 = vadd.f32 %v2147_v16, %v2052_v12  ;;  %v2423_v5 = vpop.f32.mrf.mxu1 }
 0x2b2   :  { %2777 = vst [vmem:[#allocation9 + $0x20] sm:$0xff] %v2226_v24  ;;  %v2228_v61 = vadd.f32 %v2227_v0, %v2148_v37 }
 0x2b4   :  { %2778 = vst [vmem:[#allocation9 + $0x28] sm:$0xff] %v2228_v61 }
 0x2b7   :  { %v2309_v3 = vpop.f32.mrf.mxu0 }
 0x2b8   :  { %v2422_v9 = vadd.f32 %v2421_v14, %v2309_v3  ;;  %v2592_v40 = vpop.f32.mrf.mxu1 }
 0x2b9   :  { %v2311_v63 = vpop.f32.mrf.mxu0 }
 0x2ba   :  { %v2424_v15 = vadd.f32 %v2423_v5, %v2311_v63  ;;  %v2594_v53 = vpop.f32.mrf.mxu1 }
 0x2c1   :  { %v2510_v57 = vpop.f32.mrf.mxu0 }
 0x2c2   :  { %v2511_v52 = vadd.f32 %v2510_v57, %v2422_v9  ;;  %v2768_v55 = vpop.f32.mrf.mxu1 }
 0x2c3   :  { %v2512_v41 = vpop.f32.mrf.mxu0 }
 0x2c4   :  { %v2513_v17 = vadd.f32 %v2512_v41, %v2424_v15  ;;  %v2593_v54 = vadd.f32 %v2592_v40, %v2511_v52  ;;  %v2770_v30 = vpop.f32.mrf.mxu1 }
 0x2c6   :  { %v2595_v58 = vadd.f32 %v2594_v53, %v2513_v17 }
 0x2ca   :  { %v2688_v20 = vpop.f32.mrf.mxu0 }
 0x2cb   :  { %v2689_v56 = vadd.f32 %v2688_v20, %v2593_v54 }
 0x2cc   :  { %v2690_v25 = vpop.f32.mrf.mxu0 }
 0x2cd   :  { %v2769_v27 = vadd.f32 %v2768_v55, %v2689_v56  ;;  %v2691_v28 = vadd.f32 %v2690_v25, %v2595_v58 }
 0x2cf   :  { %2779 = vst [vmem:[#allocation9 + $0x30] sm:$0xff] %v2769_v27  ;;  %v2771_v31 = vadd.f32 %v2770_v30, %v2691_v28 }
 0x2d1   :  { %2780 = vst [vmem:[#allocation9 + $0x38] sm:$0xff] %v2771_v31 }
 0x2d2   :  { %3013 = shalt.err (!%p3010_p10)
}
 0x2d3   :  { %2800 = dma.vmem_to_hbm [thread:$0]  %s2798_s16, 1024, %s3704_s5, [#allocation10]  }
 0x2d4   :  { %3026 = dma.done.wait [#allocation4], 128  }
 0x2d5   :  { %3027 = vsyncadd [#allocation4], 4294967168 }
 0x2d6   :  { %3028 = dma.done.wait [#allocation10], 1024  }
 0x2d7   :  { %3029 = vsyncadd [#allocation10], 4294966272 }
 0x2d8   :  { %2807 = vsyncpa [#allocation3], 1 }
 0x2d9   :  { %2808 = vsyncpa [#allocation6], 1 }
 0x2da   :  { %2809 = vsyncpa [#allocation4], 1 }
 0x2db   :  { %2810 = vsyncpa [#allocation10], 1 }

</bundles_post_ra>
